<compile_context>
chip_gen: v6e
topology: v6e:2x2x1
jax: 0.10.0
libtpu: 0.0.40
codegen_flags: <defaults>
</compile_context>

<pallas_src>
import math
from functools import partial

import jax
import jax.numpy as jnp
from jax.experimental import pallas as pl
from jax.experimental.pallas import tpu as pltpu


# ------------------------------- Pallas kernel -------------------------------

def layernorm_kernel(x_ref, g_ref, b_ref, o_ref, *, eps):
    # One (TILE_M, D) tile. Statistics in f32.
    x = x_ref[...].astype(jnp.float32)                       # (TILE_M, D)
    d = x.shape[-1]
    mean = jnp.mean(x, axis=-1, keepdims=True)               # XLU reduce
    c = x - mean
    # torch.std semantics: unbiased variance (correction=1).
    var = jnp.sum(c * c, axis=-1, keepdims=True) * (1.0 / (d - 1))
    std = jnp.sqrt(var)
    # eps is added to std (NOT inside the sqrt) to match the PyTorch module.
    inv = pl.reciprocal(std + eps, approx=True)               # EUP vrcp, ~free
    o_ref[...] = (g_ref[...] * (c * inv) + b_ref[...]).astype(o_ref.dtype)


# ------------------------------- Python wrapper -------------------------------

def layer_norm(x, gamma, beta, eps=1e-6):
    """Row-tiled Pallas LayerNorm over the last axis of x."""
    *lead, d = x.shape
    m = 1
    for s in lead:
        m *= s
    x2 = x.reshape(m, d)

    # Pick the row-tile: big enough to amortize per-step overhead / approach the
    # HBM roofline, small enough that the ~4 live (TILE_M, D) f32 tiles
    # (double-buffered input + output) stay well inside scoped VMEM on every
    # TPU generation (v5e 16 MiB / v6e 32 MiB / v7x 32 MiB defaults).
    vmem_budget = 8 * 1024 * 1024
    tile_m = vmem_budget // (4 * d * 4)
    tile_m = max(8, min(512, (tile_m // 8) * 8))

    # Pad the row axis to a multiple of the tile (padded rows produce finite
    # values and are sliced off afterwards).
    m_pad = ((m + tile_m - 1) // tile_m) * tile_m
    if m_pad != m:
        x2 = jnp.pad(x2, ((0, m_pad - m), (0, 0)))

    itemsize = jnp.dtype(x.dtype).itemsize
    out = pl.pallas_call(
        partial(layernorm_kernel, eps=eps),
        grid=(m_pad // tile_m,),
        out_shape=jax.ShapeDtypeStruct((m_pad, d), x.dtype),
        in_specs=[
            pl.BlockSpec((tile_m, d), lambda i: (i, 0)),     # x tile
            pl.BlockSpec((1, d), lambda i: (0, 0)),          # gamma (a_2)
            pl.BlockSpec((1, d), lambda i: (0, 0)),          # beta  (b_2)
        ],
        out_specs=pl.BlockSpec((tile_m, d), lambda i: (i, 0)),
        compiler_params=pltpu.CompilerParams(
            dimension_semantics=("parallel",)),              # megacore on v7x
        cost_estimate=pl.CostEstimate(
            flops=5 * m_pad * d,
            transcendentals=2 * m_pad,                       # sqrt + recip per row
            bytes_accessed=2 * m_pad * d * itemsize + 2 * d * 4),
    )(x2,
      gamma.reshape(1, d).astype(jnp.float32),
      beta.reshape(1, d).astype(jnp.float32))

    if m_pad != m:
        out = out[:m]
    return out.reshape(*lead, d)


# --------------------------------- Reference ----------------------------------

def ref_layernorm(x, g, b, eps=1e-6):
    x = x.astype(jnp.float32)
    mean = jnp.mean(x, axis=-1, keepdims=True)
    c = x - mean
    var = jnp.sum(c * c, axis=-1, keepdims=True) / (x.shape[-1] - 1)
    return g * c / (jnp.sqrt(var) + eps) + b


# ------------------------------------ Main -------------------------------------

if __name__ == "__main__":
    key = jax.random.PRNGKey(0)
    kx, kg, kb, kx2 = jax.random.split(key, 4)

    # Primary case: batch=2, seq=8, features=128 (lane-dense last dim).
    B, S, D = 2, 8, 128
    x = jax.random.normal(kx, (B, S, D), jnp.float32)
    gamma = 1.0 + 0.1 * jax.random.normal(kg, (D,), jnp.float32)
    beta = 0.1 * jax.random.normal(kb, (D,), jnp.float32)

    out = jax.block_until_ready(layer_norm(x, gamma, beta))
    ref = ref_layernorm(x, gamma, beta)
    assert out.shape == (B, S, D), out.shape
    assert bool(jnp.all(jnp.isfinite(out)))
    assert float(jnp.max(jnp.abs(out - ref))) < 1e-2  # approx-recip tolerance

    # Secondary case: non-128 feature dim and a row count that needs padding.
    D2 = 32
    x2 = jax.random.normal(kx2, (3, 7, D2), jnp.float32)
    g2 = jnp.ones((D2,), jnp.float32)
    b2 = jnp.zeros((D2,), jnp.float32)
    out2 = jax.block_until_ready(layer_norm(x2, g2, b2))
    ref2 = ref_layernorm(x2, g2, b2)
    assert out2.shape == (3, 7, D2)
    assert float(jnp.max(jnp.abs(out2 - ref2))) < 1e-2

    print("KERNEL_OK")
</pallas_src>

<mosaic_0001>
module attributes {stable_mosaic.version = 11 : i64} {
  func.func @layernorm_kernel(%arg0: i32, %arg1: memref<512x128xf32, #tpu.memory_space<vmem>>, %arg2: memref<1x128xf32, #tpu.memory_space<vmem>>, %arg3: memref<1x128xf32, #tpu.memory_space<vmem>>, %arg4: memref<512x128xf32, #tpu.memory_space<vmem>>) attributes {dimension_semantics = [#tpu.dimension_semantics<parallel>], iteration_bounds = array<i64: 1>, scalar_prefetch = 0 : i64, scratch_operands = 0 : i64, tpu.core_type = #tpu.core_type<tc>, window_params = [{transform_indices = @transform_0, window_bounds = array<i64: 512, 128>}, {pipeline_mode = #tpu.pipeline_mode<synchronous>, transform_indices = @transform_1, window_bounds = array<i64: 1, 128>}, {pipeline_mode = #tpu.pipeline_mode<synchronous>, transform_indices = @transform_2, window_bounds = array<i64: 1, 128>}, {transform_indices = @transform_3, window_bounds = array<i64: 512, 128>}]} {
    %c0 = arith.constant 0 : index
    %c0_0 = arith.constant 0 : index
    %0 = vector.load %arg1[%c0, %c0_0] : memref<512x128xf32, #tpu.memory_space<vmem>>, vector<512x128xf32>
    %cst = arith.constant dense<0.000000e+00> : vector<512xf32>
    %1 = vector.multi_reduction <add>, %0, %cst [1] : vector<512x128xf32> to vector<512xf32>
    %2 = vector.shape_cast %1 : vector<512xf32> to vector<512x1xf32>
    %cst_1 = arith.constant 1.280000e+02 : f32
    %3 = vector.broadcast %cst_1 : f32 to vector<512x1xf32>
    %4 = arith.divf %2, %3 : vector<512x1xf32>
    %5 = vector.broadcast %4 : vector<512x1xf32> to vector<512x128xf32>
    %6 = arith.subf %0, %5 : vector<512x128xf32>
    %7 = arith.mulf %6, %6 : vector<512x128xf32>
    %cst_2 = arith.constant dense<0.000000e+00> : vector<512xf32>
    %8 = vector.multi_reduction <add>, %7, %cst_2 [1] : vector<512x128xf32> to vector<512xf32>
    %9 = vector.shape_cast %8 : vector<512xf32> to vector<512x1xf32>
    %cst_3 = arith.constant 0.00787401571 : f32
    %10 = vector.broadcast %cst_3 : f32 to vector<512x1xf32>
    %11 = arith.mulf %9, %10 : vector<512x1xf32>
    %12 = math.sqrt %11 : vector<512x1xf32>
    %cst_4 = arith.constant 9.99999997E-7 : f32
    %13 = vector.broadcast %cst_4 : f32 to vector<512x1xf32>
    %14 = arith.addf %12, %13 : vector<512x1xf32>
    %15 = tpu.reciprocal %14 {approx = true} : vector<512x1xf32> -> vector<512x1xf32>
    %c0_5 = arith.constant 0 : index
    %c0_6 = arith.constant 0 : index
    %16 = vector.load %arg2[%c0_5, %c0_6] : memref<1x128xf32, #tpu.memory_space<vmem>>, vector<1x128xf32>
    %17 = vector.broadcast %15 : vector<512x1xf32> to vector<512x128xf32>
    %18 = arith.mulf %6, %17 : vector<512x128xf32>
    %19 = vector.broadcast %16 : vector<1x128xf32> to vector<512x128xf32>
    %20 = arith.mulf %19, %18 : vector<512x128xf32>
    %c0_7 = arith.constant 0 : index
    %c0_8 = arith.constant 0 : index
    %21 = vector.load %arg3[%c0_7, %c0_8] : memref<1x128xf32, #tpu.memory_space<vmem>>, vector<1x128xf32>
    %22 = vector.broadcast %21 : vector<1x128xf32> to vector<512x128xf32>
    %23 = arith.addf %20, %22 : vector<512x128xf32>
    %c0_9 = arith.constant 0 : index
    %c0_10 = arith.constant 0 : index
    %24 = vector.load %arg4[%c0_9, %c0_10] : memref<512x128xf32, #tpu.memory_space<vmem>>, vector<512x128xf32>
    tpu.vector_store %arg4[%c0_9, %c0_10], %23 {strides = array<i32>} : memref<512x128xf32, #tpu.memory_space<vmem>>, vector<512x128xf32>,
    return
  }
  func.func @transform_0(%arg0: i32) -> (i32, i32) {
    %c0_i32 = arith.constant 0 : i32
    %c0_i32_0 = arith.constant 0 : i32
    return %arg0, %c0_i32 : i32, i32
  }
  func.func @transform_1(%arg0: i32) -> (i32, i32) {
    %c0_i32 = arith.constant 0 : i32
    %c0_i32_0 = arith.constant 0 : i32
    %c0_i32_1 = arith.constant 0 : i32
    return %c0_i32, %c0_i32_0 : i32, i32
  }
  func.func @transform_2(%arg0: i32) -> (i32, i32) {
    %c0_i32 = arith.constant 0 : i32
    %c0_i32_0 = arith.constant 0 : i32
    %c0_i32_1 = arith.constant 0 : i32
    return %c0_i32, %c0_i32_0 : i32, i32
  }
  func.func @transform_3(%arg0: i32) -> (i32, i32) {
    %c0_i32 = arith.constant 0 : i32
    %c0_i32_0 = arith.constant 0 : i32
    return %arg0, %c0_i32 : i32, i32
  }
}

</mosaic_0001>

<bundles_post_ra>
// kernel: tpu_custom_call.1
= control target key start
LH: loop header
LB: loop body
LE: loop exit
PB: predicated region body
PF: predicated region fallthrough
CT: control target
= control target key end

     0   :  { %8 = vsyncpa [#allocation3], 0  ;;  %s3220_s0 = inlined_call_operand.hbm [shape: f32[512,128], index: 0, kind: input, shape index: {}]   ;;  %s3221_s1 = inlined_call_operand.vmem [shape: f32[1,128], index: 1, kind: input, shape index: {}]   ;;  %s3222_s2 = inlined_call_operand.vmem [shape: f32[1,128], index: 2, kind: input, shape index: {}]   ;;  %s3223_s3 = inlined_call_operand.hbm [shape: f32[512,128], index: 3, kind: output, shape index: {}]  }
   0x1   :  { %9 = vsyncpa [#allocation4], 0  ;;  %s1777_s12 = smov [#allocation2]  }
   0x2   :  { %s15_s13 = sshll.u32 %s1777_s12, 4  ;;  %s16_s13 = int_to_ptr.vmem [resolvable:$true] %s15_s13 }
   0x3   :  { %s1741_s14 = scalar_lea.vmem %s16_s13, 8192  ;;  %p1746_p1 = scmp.lt.s32.totalorder %s16_s13, %s16_s13 }
   0x4   :  { %p1742_p0 = scmp.ne.s32.totalorder %s16_s13, %s1741_s14  ;;  %p1747_p2 = scmp.lt.s32.totalorder %s1741_s14, %s1741_s14 }
   0x6   :  { %p1748_p3 = por %p1747_p2, %p1746_p1 }
   0x8   :  { %p1749_p4 = pnand %p1748_p3, %p1742_p0 }
   0xa   :  { %1752 = shalt.err (!%p1749_p4)
}
   0xb   :  { %s1778_s15 = smov 128   ;;  %s1779_s16 = smov 8  }
   0xc   :  { %21 = dma.hbm_to_vmem [thread:$0]  %s3220_s0, 8192, %s16_s13, [#allocation3], %s1778_s15, %s1778_s15, %s1779_s16  }
   0xd   :  { %1773 = dma.done.wait [#allocation3], 8192  }
   0xe   :  { %1774 = vsyncadd [#allocation3], 4294959104  ;;  %v1807_v0 = vld [vmem:[#allocation2] sm:$0xff]  ;;  %v1809_v1 = vld [vmem:[#allocation2 + $0x10] sm:$0xff] }
   0xf   :  { %93 = vadd.xlane.f32.xlu0 %v1807_v0  ;;  %97 = vadd.xlane.f32.xlu1 %v1809_v1  ;;  %v1813_v2 = vld [vmem:[#allocation2 + $0x8] sm:$0xff]  ;;  %v1815_v3 = vld [vmem:[#allocation2 + $0x18] sm:$0xff]  ;;  %v1819_v4 = vld [vmem:[#allocation2 + $0x20] sm:$0xff] }
  0x10   :  { %v1821_v5 = vld [vmem:[#allocation2 + $0x28] sm:$0xff]  ;;  %v1825_v6 = vld [vmem:[#allocation2 + $0x30] sm:$0xff]  ;;  %v1827_v7 = vld [vmem:[#allocation2 + $0x38] sm:$0xff] }
  0x11   :  { %v1831_v8 = vld [vmem:[#allocation2 + $0x40] sm:$0xff]  ;;  %v1833_v9 = vld [vmem:[#allocation2 + $0x48] sm:$0xff]  ;;  %v1837_v10 = vld [vmem:[#allocation2 + $0x50] sm:$0xff] }
  0x12   :  { %v1839_v11 = vld [vmem:[#allocation2 + $0x58] sm:$0xff]  ;;  %v1843_v12 = vld [vmem:[#allocation2 + $0x60] sm:$0xff]  ;;  %v1845_v13 = vld [vmem:[#allocation2 + $0x68] sm:$0xff] }
  0x13   :  { %95 = vadd.xlane.f32.xlu0 %v1813_v2  ;;  %99 = vadd.xlane.f32.xlu1 %v1815_v3  ;;  %v1849_v14 = vld [vmem:[#allocation2 + $0x70] sm:$0xff]  ;;  %v1851_v15 = vld [vmem:[#allocation2 + $0x78] sm:$0xff]  ;;  %v1855_v16 = vld [vmem:[#allocation2 + $0x80] sm:$0xff] }
  0x14   :  { %v1857_v17 = vld [vmem:[#allocation2 + $0x88] sm:$0xff]  ;;  %v1861_v18 = vld [vmem:[#allocation2 + $0x90] sm:$0xff]  ;;  %v1863_v19 = vld [vmem:[#allocation2 + $0x98] sm:$0xff] }
  0x15   :  { %v1867_v20 = vld [vmem:[#allocation2 + $0xa0] sm:$0xff]  ;;  %v1869_v21 = vld [vmem:[#allocation2 + $0xa8] sm:$0xff]  ;;  %v1873_v22 = vld [vmem:[#allocation2 + $0xb0] sm:$0xff] }
  0x16   :  { %v1875_v23 = vld [vmem:[#allocation2 + $0xb8] sm:$0xff]  ;;  %v1879_v24 = vld [vmem:[#allocation2 + $0xc0] sm:$0xff]  ;;  %v1881_v25 = vld [vmem:[#allocation2 + $0xc8] sm:$0xff] }
  0x17   :  { %101 = vadd.xlane.f32.xlu0 %v1819_v4  ;;  %103 = vadd.xlane.f32.xlu1 %v1821_v5  ;;  %v1885_v26 = vld [vmem:[#allocation2 + $0xd0] sm:$0xff]  ;;  %v1887_v27 = vld [vmem:[#allocation2 + $0xd8] sm:$0xff]  ;;  %v1891_v28 = vld [vmem:[#allocation2 + $0xe0] sm:$0xff] }
  0x18   :  { %v1893_v29 = vld [vmem:[#allocation2 + $0xe8] sm:$0xff]  ;;  %v1897_v30 = vld [vmem:[#allocation2 + $0xf0] sm:$0xff]  ;;  %v1899_v31 = vld [vmem:[#allocation2 + $0xf8] sm:$0xff] }
  0x19   :  { %v1903_v32 = vld [vmem:[#allocation2 + $0x100] sm:$0xff]  ;;  %v1905_v33 = vld [vmem:[#allocation2 + $0x108] sm:$0xff]  ;;  %v1909_v34 = vld [vmem:[#allocation2 + $0x110] sm:$0xff] }
  0x1a   :  { %v1911_v35 = vld [vmem:[#allocation2 + $0x118] sm:$0xff]  ;;  %v1915_v36 = vld [vmem:[#allocation2 + $0x120] sm:$0xff]  ;;  %v1917_v37 = vld [vmem:[#allocation2 + $0x128] sm:$0xff] }
  0x1b   :  { %105 = vadd.xlane.f32.xlu0 %v1825_v6  ;;  %107 = vadd.xlane.f32.xlu1 %v1827_v7  ;;  %v1921_v38 = vld [vmem:[#allocation2 + $0x130] sm:$0xff]  ;;  %v1923_v39 = vld [vmem:[#allocation2 + $0x138] sm:$0xff]  ;;  %v1927_v40 = vld [vmem:[#allocation2 + $0x140] sm:$0xff] }
  0x1c   :  { %v1929_v41 = vld [vmem:[#allocation2 + $0x148] sm:$0xff]  ;;  %v1933_v42 = vld [vmem:[#allocation2 + $0x150] sm:$0xff]  ;;  %v1935_v43 = vld [vmem:[#allocation2 + $0x158] sm:$0xff] }
  0x1d   :  { %v1939_v44 = vld [vmem:[#allocation2 + $0x160] sm:$0xff]  ;;  %v1941_v45 = vld [vmem:[#allocation2 + $0x168] sm:$0xff]  ;;  %v1945_v46 = vld [vmem:[#allocation2 + $0x170] sm:$0xff] }
  0x1e   :  { %v1947_v47 = vld [vmem:[#allocation2 + $0x178] sm:$0xff]  ;;  %v1951_v48 = vld [vmem:[#allocation2 + $0x180] sm:$0xff]  ;;  %v1953_v49 = vld [vmem:[#allocation2 + $0x188] sm:$0xff] }
  0x1f   :  { %109 = vadd.xlane.f32.xlu0 %v1831_v8  ;;  %111 = vadd.xlane.f32.xlu1 %v1833_v9  ;;  %v1957_v50 = vld [vmem:[#allocation2 + $0x190] sm:$0xff]  ;;  %v1959_v51 = vld [vmem:[#allocation2 + $0x198] sm:$0xff]  ;;  %v1963_v52 = vld [vmem:[#allocation2 + $0x1a0] sm:$0xff] }
  0x20   :  { %3262 = vst [vmem:[#allocation8_spill] sm:$0xff] %v1959_v51  ;;  %3263 = vst [vmem:[#allocation9_spill] sm:$0xff] %v1963_v52  ;;  %v1965_v53 = vld [vmem:[#allocation2 + $0x1a8] sm:$0xff]  ;;  %v1969_v54 = vld [vmem:[#allocation2 + $0x1b0] sm:$0xff] }
  0x21   :  { %3264 = vst [vmem:[#allocation10_spill] sm:$0xff] %v1965_v53  ;;  %3265 = vst [vmem:[#allocation11_spill] sm:$0xff] %v1969_v54  ;;  %v1971_v55 = vld [vmem:[#allocation2 + $0x1b8] sm:$0xff]  ;;  %v1975_v56 = vld [vmem:[#allocation2 + $0x1c0] sm:$0xff] }
  0x22   :  { %3266 = vst [vmem:[#allocation12_spill] sm:$0xff] %v1971_v55  ;;  %3267 = vst [vmem:[#allocation13_spill] sm:$0xff] %v1975_v56  ;;  %v1977_v57 = vld [vmem:[#allocation2 + $0x1c8] sm:$0xff]  ;;  %v1981_v58 = vld [vmem:[#allocation2 + $0x1d0] sm:$0xff] }
  0x23   :  { %113 = vadd.xlane.f32.xlu0 %v1837_v10  ;;  %115 = vadd.xlane.f32.xlu1 %v1839_v11  ;;  %3268 = vst [vmem:[#allocation14_spill] sm:$0xff] %v1977_v57  ;;  %3269 = vst [vmem:[#allocation15_spill] sm:$0xff] %v1981_v58  ;;  %v1983_v59 = vld [vmem:[#allocation2 + $0x1d8] sm:$0xff]  ;;  %v1987_v60 = vld [vmem:[#allocation2 + $0x1e0] sm:$0xff] }
  0x24   :  { %3270 = vst [vmem:[#allocation16_spill] sm:$0xff] %v1983_v59  ;;  %3271 = vst [vmem:[#allocation17_spill] sm:$0xff] %v1987_v60  ;;  %v1989_v61 = vld [vmem:[#allocation2 + $0x1e8] sm:$0xff]  ;;  %v1993_v62 = vld [vmem:[#allocation2 + $0x1f0] sm:$0xff] }
  0x25   :  { %3272 = vst [vmem:[#allocation18_spill] sm:$0xff] %v1989_v61  ;;  %v1995_v63 = vld [vmem:[#allocation2 + $0x1f8] sm:$0xff] }
  0x26   :  { %3273 = vst [vmem:[#allocation19_spill] sm:$0xff] %v1995_v63 }
  0x27   :  { %117 = vadd.xlane.f32.xlu0 %v1843_v12  ;;  %119 = vadd.xlane.f32.xlu1 %v1845_v13 }
  0x2b   :  { %121 = vadd.xlane.f32.xlu0 %v1849_v14  ;;  %123 = vadd.xlane.f32.xlu1 %v1851_v15 }
  0x2f   :  { %125 = vadd.xlane.f32.xlu0 %v1855_v16  ;;  %127 = vadd.xlane.f32.xlu1 %v1857_v17 }
  0x33   :  { %129 = vadd.xlane.f32.xlu0 %v1861_v18  ;;  %131 = vadd.xlane.f32.xlu1 %v1863_v19 }
  0x37   :  { %133 = vadd.xlane.f32.xlu0 %v1867_v20  ;;  %135 = vadd.xlane.f32.xlu1 %v1869_v21 }
  0x3b   :  { %137 = vadd.xlane.f32.xlu0 %v1873_v22  ;;  %139 = vadd.xlane.f32.xlu1 %v1875_v23 }
  0x3f   :  { %141 = vadd.xlane.f32.xlu0 %v1879_v24  ;;  %143 = vadd.xlane.f32.xlu1 %v1881_v25 }
  0x43   :  { %145 = vadd.xlane.f32.xlu0 %v1885_v26  ;;  %147 = vadd.xlane.f32.xlu1 %v1887_v27 }
  0x47   :  { %149 = vadd.xlane.f32.xlu0 %v1891_v28  ;;  %151 = vadd.xlane.f32.xlu1 %v1893_v29 }
  0x4b   :  { %153 = vadd.xlane.f32.xlu0 %v1897_v30  ;;  %155 = vadd.xlane.f32.xlu1 %v1899_v31 }
  0x4f   :  { %157 = vadd.xlane.f32.xlu0 %v1903_v32  ;;  %159 = vadd.xlane.f32.xlu1 %v1905_v33 }
  0x53   :  { %161 = vadd.xlane.f32.xlu0 %v1909_v34  ;;  %163 = vadd.xlane.f32.xlu1 %v1911_v35 }
  0x57   :  { %165 = vadd.xlane.f32.xlu0 %v1915_v36  ;;  %167 = vadd.xlane.f32.xlu1 %v1917_v37 }
  0x5b   :  { %169 = vadd.xlane.f32.xlu0 %v1921_v38  ;;  %171 = vadd.xlane.f32.xlu1 %v1923_v39 }
  0x5f   :  { %173 = vadd.xlane.f32.xlu0 %v1927_v40  ;;  %175 = vadd.xlane.f32.xlu1 %v1929_v41 }
  0x63   :  { %177 = vadd.xlane.f32.xlu0 %v1933_v42  ;;  %179 = vadd.xlane.f32.xlu1 %v1935_v43 }
  0x67   :  { %181 = vadd.xlane.f32.xlu0 %v1939_v44  ;;  %183 = vadd.xlane.f32.xlu1 %v1941_v45 }
  0x6b   :  { %185 = vadd.xlane.f32.xlu0 %v1945_v46  ;;  %187 = vadd.xlane.f32.xlu1 %v1947_v47 }
  0x6f   :  { %189 = vadd.xlane.f32.xlu0 %v1951_v48  ;;  %191 = vadd.xlane.f32.xlu1 %v1953_v49 }
  0x73   :  { %193 = vadd.xlane.f32.xlu0 %v1957_v50  ;;  %195 = vadd.xlane.f32.xlu1 %v1959_v51 }
  0x77   :  { %197 = vadd.xlane.f32.xlu0 %v1963_v52  ;;  %199 = vadd.xlane.f32.xlu1 %v1965_v53 }
  0x7b   :  { %201 = vadd.xlane.f32.xlu0 %v1969_v54  ;;  %203 = vadd.xlane.f32.xlu1 %v1971_v55 }
  0x7f   :  { %205 = vadd.xlane.f32.xlu0 %v1975_v56  ;;  %207 = vadd.xlane.f32.xlu1 %v1977_v57 }
  0x83   :  { %209 = vadd.xlane.f32.xlu0 %v1981_v58  ;;  %211 = vadd.xlane.f32.xlu1 %v1983_v59 }
  0x87   :  { %213 = vadd.xlane.f32.xlu0 %v1987_v60  ;;  %215 = vadd.xlane.f32.xlu1 %v1989_v61 }
  0x8b   :  { %217 = vadd.xlane.f32.xlu0 %v1993_v62  ;;  %219 = vadd.xlane.f32.xlu1 %v1995_v63 }
  0x98   :  { %v94_v57 = vpop.xlane.xlu0 %93  ;;  %v98_v58 = vpop.xlane.xlu1 %97 }
  0x99   :  { %v222_v56 = vmul.f32 0.0078125, %v94_v57  ;;  %v224_v59 = vmul.f32 0.0078125, %v98_v58 }
  0x9b   :  { %v2000_v55 = vsub.f32 %v1807_v0, %v222_v56  ;;  %v2003_v54 = vsub.f32 %v1809_v1, %v224_v59 }
  0x9c   :  { %v96_v60 = vpop.xlane.xlu0 %95  ;;  %v100_v61 = vpop.xlane.xlu1 %99 }
  0x9d   :  { %3274 = vst [vmem:[#allocation20_spill] sm:$0xff] %v2003_v54  ;;  %v223_v53 = vmul.f32 0.0078125, %v96_v60  ;;  %v350_v52 = vmul.f32 %v2000_v55, %v2000_v55  ;;  %v225_v51 = vmul.f32 0.0078125, %v100_v61  ;;  %v352_v63 = vmul.f32 %v2003_v54, %v2003_v54 }
  0x9f   :  { %414 = vadd.xlane.f32.xlu0 %v350_v52  ;;  %v2010_v57 = vsub.f32 %v1813_v2, %v223_v53  ;;  %v2013_v0 = vsub.f32 %v1815_v3, %v225_v51 }
  0xa0   :  { %v102_v56 = vpop.xlane.xlu0 %101  ;;  %v104_v1 = vpop.xlane.xlu1 %103 }
  0xa1   :  { %v226_v58 = vmul.f32 0.0078125, %v102_v56  ;;  %v351_v59 = vmul.f32 %v2010_v57, %v2010_v57  ;;  %v227_v60 = vmul.f32 0.0078125, %v104_v1  ;;  %v353_v52 = vmul.f32 %v2013_v0, %v2013_v0 }
  0xa3   :  { %418 = vadd.xlane.f32.xlu0 %v352_v63  ;;  %416 = vadd.xlane.f32.xlu1 %v351_v59  ;;  %v2020_v61 = vsub.f32 %v1819_v4, %v226_v58  ;;  %v2023_v2 = vsub.f32 %v1821_v5, %v227_v60 }
  0xa4   :  { %v106_v3 = vpop.xlane.xlu0 %105  ;;  %v108_v51 = vpop.xlane.xlu1 %107 }
  0xa5   :  { %v228_v53 = vmul.f32 0.0078125, %v106_v3  ;;  %v354_v56 = vmul.f32 %v2020_v61, %v2020_v61  ;;  %v229_v54 = vmul.f32 0.0078125, %v108_v51  ;;  %v355_v63 = vmul.f32 %v2023_v2, %v2023_v2 }
  0xa7   :  { %420 = vadd.xlane.f32.xlu1 %v353_v52  ;;  %422 = vadd.xlane.f32.xlu0 %v354_v56  ;;  %v2030_v1 = vsub.f32 %v1825_v6, %v228_v53  ;;  %v2033_v4 = vsub.f32 %v1827_v7, %v229_v54 }
  0xa8   :  { %v110_v5 = vpop.xlane.xlu0 %109  ;;  %v112_v58 = vpop.xlane.xlu1 %111 }
  0xa9   :  { %v230_v59 = vmul.f32 0.0078125, %v110_v5  ;;  %v356_v60 = vmul.f32 %v2030_v1, %v2030_v1  ;;  %v231_v3 = vmul.f32 0.0078125, %v112_v58  ;;  %v357_v52 = vmul.f32 %v2033_v4, %v2033_v4 }
  0xab   :  { %424 = vadd.xlane.f32.xlu1 %v355_v63  ;;  %426 = vadd.xlane.f32.xlu0 %v356_v60  ;;  %v2040_v51 = vsub.f32 %v1831_v8, %v230_v59  ;;  %v2043_v6 = vsub.f32 %v1833_v9, %v231_v3 }
  0xac   :  { %v114_v7 = vpop.xlane.xlu0 %113  ;;  %v116_v54 = vpop.xlane.xlu1 %115 }
  0xad   :  { %v232_v53 = vmul.f32 0.0078125, %v114_v7  ;;  %v358_v56 = vmul.f32 %v2040_v51, %v2040_v51  ;;  %v233_v5 = vmul.f32 0.0078125, %v116_v54  ;;  %v359_v63 = vmul.f32 %v2043_v6, %v2043_v6 }
  0xaf   :  { %428 = vadd.xlane.f32.xlu1 %v357_v52  ;;  %430 = vadd.xlane.f32.xlu0 %v358_v56  ;;  %v2050_v58 = vsub.f32 %v1837_v10, %v232_v53  ;;  %v2053_v8 = vsub.f32 %v1839_v11, %v233_v5 }
  0xb0   :  { %v118_v9 = vpop.xlane.xlu0 %117  ;;  %v120_v59 = vpop.xlane.xlu1 %119 }
  0xb1   :  { %v234_v60 = vmul.f32 0.0078125, %v118_v9  ;;  %v360_v3 = vmul.f32 %v2050_v58, %v2050_v58  ;;  %v235_v7 = vmul.f32 0.0078125, %v120_v59  ;;  %v361_v52 = vmul.f32 %v2053_v8, %v2053_v8 }
  0xb3   :  { %432 = vadd.xlane.f32.xlu1 %v359_v63  ;;  %434 = vadd.xlane.f32.xlu0 %v360_v3  ;;  %v2060_v54 = vsub.f32 %v1843_v12, %v234_v60  ;;  %v2063_v10 = vsub.f32 %v1845_v13, %v235_v7 }
  0xb4   :  { %v122_v11 = vpop.xlane.xlu0 %121  ;;  %v124_v53 = vpop.xlane.xlu1 %123 }
  0xb5   :  { %v236_v56 = vmul.f32 0.0078125, %v122_v11  ;;  %v362_v5 = vmul.f32 %v2060_v54, %v2060_v54  ;;  %v237_v9 = vmul.f32 0.0078125, %v124_v53  ;;  %v363_v63 = vmul.f32 %v2063_v10, %v2063_v10 }
  0xb7   :  { %436 = vadd.xlane.f32.xlu1 %v361_v52  ;;  %438 = vadd.xlane.f32.xlu0 %v362_v5  ;;  %v2070_v59 = vsub.f32 %v1849_v14, %v236_v56  ;;  %v2073_v12 = vsub.f32 %v1851_v15, %v237_v9 }
  0xb8   :  { %v126_v13 = vpop.xlane.xlu0 %125  ;;  %v128_v60 = vpop.xlane.xlu1 %127 }
  0xb9   :  { %v238_v3 = vmul.f32 0.0078125, %v126_v13  ;;  %v364_v7 = vmul.f32 %v2070_v59, %v2070_v59  ;;  %v239_v11 = vmul.f32 0.0078125, %v128_v60  ;;  %v365_v52 = vmul.f32 %v2073_v12, %v2073_v12 }
  0xbb   :  { %440 = vadd.xlane.f32.xlu1 %v363_v63  ;;  %442 = vadd.xlane.f32.xlu0 %v364_v7  ;;  %v2080_v53 = vsub.f32 %v1855_v16, %v238_v3  ;;  %v2083_v14 = vsub.f32 %v1857_v17, %v239_v11 }
  0xbc   :  { %v130_v15 = vpop.xlane.xlu0 %129  ;;  %v132_v56 = vpop.xlane.xlu1 %131 }
  0xbd   :  { %v240_v5 = vmul.f32 0.0078125, %v130_v15  ;;  %v366_v9 = vmul.f32 %v2080_v53, %v2080_v53  ;;  %v241_v13 = vmul.f32 0.0078125, %v132_v56  ;;  %v367_v63 = vmul.f32 %v2083_v14, %v2083_v14 }
  0xbf   :  { %444 = vadd.xlane.f32.xlu1 %v365_v52  ;;  %446 = vadd.xlane.f32.xlu0 %v366_v9  ;;  %v2090_v60 = vsub.f32 %v1861_v18, %v240_v5  ;;  %v2093_v16 = vsub.f32 %v1863_v19, %v241_v13 }
  0xc0   :  { %v134_v17 = vpop.xlane.xlu0 %133  ;;  %v136_v3 = vpop.xlane.xlu1 %135 }
  0xc1   :  { %v242_v7 = vmul.f32 0.0078125, %v134_v17  ;;  %v368_v11 = vmul.f32 %v2090_v60, %v2090_v60  ;;  %v243_v15 = vmul.f32 0.0078125, %v136_v3  ;;  %v369_v52 = vmul.f32 %v2093_v16, %v2093_v16 }
  0xc3   :  { %448 = vadd.xlane.f32.xlu1 %v367_v63  ;;  %450 = vadd.xlane.f32.xlu0 %v368_v11  ;;  %v2100_v56 = vsub.f32 %v1867_v20, %v242_v7  ;;  %v2103_v18 = vsub.f32 %v1869_v21, %v243_v15 }
  0xc4   :  { %v138_v19 = vpop.xlane.xlu0 %137  ;;  %v140_v5 = vpop.xlane.xlu1 %139 }
  0xc5   :  { %v244_v9 = vmul.f32 0.0078125, %v138_v19  ;;  %v370_v13 = vmul.f32 %v2100_v56, %v2100_v56  ;;  %v245_v17 = vmul.f32 0.0078125, %v140_v5  ;;  %v371_v63 = vmul.f32 %v2103_v18, %v2103_v18 }
  0xc7   :  { %452 = vadd.xlane.f32.xlu1 %v369_v52  ;;  %454 = vadd.xlane.f32.xlu0 %v370_v13  ;;  %v2110_v3 = vsub.f32 %v1873_v22, %v244_v9  ;;  %v2113_v20 = vsub.f32 %v1875_v23, %v245_v17 }
  0xc8   :  { %v142_v21 = vpop.xlane.xlu0 %141  ;;  %v144_v7 = vpop.xlane.xlu1 %143 }
  0xc9   :  { %v246_v11 = vmul.f32 0.0078125, %v142_v21  ;;  %v372_v15 = vmul.f32 %v2110_v3, %v2110_v3  ;;  %v247_v19 = vmul.f32 0.0078125, %v144_v7  ;;  %v373_v52 = vmul.f32 %v2113_v20, %v2113_v20 }
  0xcb   :  { %456 = vadd.xlane.f32.xlu1 %v371_v63  ;;  %458 = vadd.xlane.f32.xlu0 %v372_v15  ;;  %v2120_v5 = vsub.f32 %v1879_v24, %v246_v11  ;;  %v2123_v22 = vsub.f32 %v1881_v25, %v247_v19 }
  0xcc   :  { %v146_v23 = vpop.xlane.xlu0 %145  ;;  %v148_v9 = vpop.xlane.xlu1 %147 }
  0xcd   :  { %v248_v13 = vmul.f32 0.0078125, %v146_v23  ;;  %v374_v17 = vmul.f32 %v2120_v5, %v2120_v5  ;;  %v249_v21 = vmul.f32 0.0078125, %v148_v9  ;;  %v375_v63 = vmul.f32 %v2123_v22, %v2123_v22 }
  0xcf   :  { %460 = vadd.xlane.f32.xlu1 %v373_v52  ;;  %462 = vadd.xlane.f32.xlu0 %v374_v17  ;;  %v2130_v7 = vsub.f32 %v1885_v26, %v248_v13  ;;  %v2133_v24 = vsub.f32 %v1887_v27, %v249_v21 }
  0xd0   :  { %v150_v25 = vpop.xlane.xlu0 %149  ;;  %v152_v11 = vpop.xlane.xlu1 %151 }
  0xd1   :  { %v250_v15 = vmul.f32 0.0078125, %v150_v25  ;;  %v376_v19 = vmul.f32 %v2130_v7, %v2130_v7  ;;  %v251_v23 = vmul.f32 0.0078125, %v152_v11  ;;  %v377_v52 = vmul.f32 %v2133_v24, %v2133_v24 }
  0xd3   :  { %464 = vadd.xlane.f32.xlu1 %v375_v63  ;;  %466 = vadd.xlane.f32.xlu0 %v376_v19  ;;  %v2140_v9 = vsub.f32 %v1891_v28, %v250_v15  ;;  %v2143_v26 = vsub.f32 %v1893_v29, %v251_v23 }
  0xd4   :  { %v154_v27 = vpop.xlane.xlu0 %153  ;;  %v156_v13 = vpop.xlane.xlu1 %155 }
  0xd5   :  { %v252_v17 = vmul.f32 0.0078125, %v154_v27  ;;  %v378_v21 = vmul.f32 %v2140_v9, %v2140_v9  ;;  %v253_v25 = vmul.f32 0.0078125, %v156_v13  ;;  %v379_v28 = vmul.f32 %v2143_v26, %v2143_v26 }
  0xd7   :  { %v2148_v11 = vsub.f32 %v1897_v30, %v252_v17  ;;  %468 = vadd.xlane.f32.xlu1 %v377_v52  ;;  %470 = vadd.xlane.f32.xlu0 %v378_v21  ;;  %v2151_v63 = vsub.f32 %v1899_v31, %v253_v25 }
  0xd8   :  { %v158_v29 = vpop.xlane.xlu0 %157  ;;  %v160_v15 = vpop.xlane.xlu1 %159 }
  0xd9   :  { %v254_v19 = vmul.f32 0.0078125, %v158_v29  ;;  %v380_v23 = vmul.f32 %v2148_v11, %v2148_v11  ;;  %v255_v27 = vmul.f32 0.0078125, %v160_v15  ;;  %v381_v31 = vmul.f32 %v2151_v63, %v2151_v63 }
  0xdb   :  { %v2158_v13 = vsub.f32 %v1903_v32, %v254_v19  ;;  %472 = vadd.xlane.f32.xlu1 %v379_v28  ;;  %474 = vadd.xlane.f32.xlu0 %v380_v23  ;;  %v2161_v30 = vsub.f32 %v1905_v33, %v255_v27 }
  0xdc   :  { %v162_v52 = vpop.xlane.xlu0 %161  ;;  %v164_v17 = vpop.xlane.xlu1 %163 }
  0xdd   :  { %v256_v21 = vmul.f32 0.0078125, %v162_v52  ;;  %v382_v25 = vmul.f32 %v2158_v13, %v2158_v13  ;;  %v257_v29 = vmul.f32 0.0078125, %v164_v17  ;;  %v383_v33 = vmul.f32 %v2161_v30, %v2161_v30 }
  0xdf   :  { %v2168_v15 = vsub.f32 %v1909_v34, %v256_v21  ;;  %476 = vadd.xlane.f32.xlu1 %v381_v31  ;;  %478 = vadd.xlane.f32.xlu0 %v382_v25  ;;  %v2171_v32 = vsub.f32 %v1911_v35, %v257_v29 }
  0xe0   :  { %v166_v28 = vpop.xlane.xlu0 %165  ;;  %v168_v19 = vpop.xlane.xlu1 %167 }
  0xe1   :  { %v258_v23 = vmul.f32 0.0078125, %v166_v28  ;;  %v384_v27 = vmul.f32 %v2168_v15, %v2168_v15  ;;  %v259_v52 = vmul.f32 0.0078125, %v168_v19  ;;  %v385_v35 = vmul.f32 %v2171_v32, %v2171_v32 }
  0xe3   :  { %v2178_v17 = vsub.f32 %v1915_v36, %v258_v23  ;;  %480 = vadd.xlane.f32.xlu1 %v383_v33  ;;  %482 = vadd.xlane.f32.xlu0 %v384_v27  ;;  %v2181_v34 = vsub.f32 %v1917_v37, %v259_v52 }
  0xe4   :  { %v170_v31 = vpop.xlane.xlu0 %169  ;;  %v172_v21 = vpop.xlane.xlu1 %171 }
  0xe5   :  { %v260_v25 = vmul.f32 0.0078125, %v170_v31  ;;  %v386_v29 = vmul.f32 %v2178_v17, %v2178_v17  ;;  %v261_v28 = vmul.f32 0.0078125, %v172_v21  ;;  %v387_v37 = vmul.f32 %v2181_v34, %v2181_v34 }
  0xe7   :  { %v2188_v19 = vsub.f32 %v1921_v38, %v260_v25  ;;  %484 = vadd.xlane.f32.xlu1 %v385_v35  ;;  %486 = vadd.xlane.f32.xlu0 %v386_v29  ;;  %v2191_v36 = vsub.f32 %v1923_v39, %v261_v28 }
  0xe8   :  { %v174_v33 = vpop.xlane.xlu0 %173  ;;  %v176_v23 = vpop.xlane.xlu1 %175 }
  0xe9   :  { %3275 = vst [vmem:[#allocation21_spill] sm:$0xff] %v2191_v36  ;;  %v262_v27 = vmul.f32 0.0078125, %v174_v33  ;;  %v388_v52 = vmul.f32 %v2188_v19, %v2188_v19  ;;  %v263_v31 = vmul.f32 0.0078125, %v176_v23  ;;  %v389_v39 = vmul.f32 %v2191_v36, %v2191_v36 }
  0xeb   :  { %v2198_v21 = vsub.f32 %v1927_v40, %v262_v27  ;;  %488 = vadd.xlane.f32.xlu1 %v387_v37  ;;  %490 = vadd.xlane.f32.xlu0 %v388_v52  ;;  %v2201_v38 = vsub.f32 %v1929_v41, %v263_v31 }
  0xec   :  { %v178_v35 = vpop.xlane.xlu0 %177  ;;  %v180_v25 = vpop.xlane.xlu1 %179 }
  0xed   :  { %3276 = vst [vmem:[#allocation22_spill] sm:$0xff] %v2198_v21  ;;  %3277 = vst [vmem:[#allocation23_spill] sm:$0xff] %v2201_v38  ;;  %v264_v29 = vmul.f32 0.0078125, %v178_v35  ;;  %v390_v28 = vmul.f32 %v2198_v21, %v2198_v21  ;;  %v265_v33 = vmul.f32 0.0078125, %v180_v25  ;;  %v391_v41 = vmul.f32 %v2201_v38, %v2201_v38 }
  0xef   :  { %v2208_v23 = vsub.f32 %v1933_v42, %v264_v29  ;;  %492 = vadd.xlane.f32.xlu1 %v389_v39  ;;  %494 = vadd.xlane.f32.xlu0 %v390_v28  ;;  %v2211_v40 = vsub.f32 %v1935_v43, %v265_v33 }
  0xf0   :  { %v182_v37 = vpop.xlane.xlu0 %181  ;;  %v184_v27 = vpop.xlane.xlu1 %183 }
  0xf1   :  { %3278 = vst [vmem:[#allocation24_spill] sm:$0xff] %v2208_v23  ;;  %3279 = vst [vmem:[#allocation25_spill] sm:$0xff] %v2211_v40  ;;  %v266_v52 = vmul.f32 0.0078125, %v182_v37  ;;  %v392_v31 = vmul.f32 %v2208_v23, %v2208_v23  ;;  %v267_v35 = vmul.f32 0.0078125, %v184_v27  ;;  %v393_v43 = vmul.f32 %v2211_v40, %v2211_v40 }
  0xf3   :  { %v2218_v25 = vsub.f32 %v1939_v44, %v266_v52  ;;  %496 = vadd.xlane.f32.xlu1 %v391_v41  ;;  %498 = vadd.xlane.f32.xlu0 %v392_v31  ;;  %v2221_v42 = vsub.f32 %v1941_v45, %v267_v35 }
  0xf4   :  { %v186_v39 = vpop.xlane.xlu0 %185  ;;  %v188_v29 = vpop.xlane.xlu1 %187 }
  0xf5   :  { %3280 = vst [vmem:[#allocation26_spill] sm:$0xff] %v2218_v25  ;;  %3281 = vst [vmem:[#allocation27_spill] sm:$0xff] %v2221_v42  ;;  %v268_v28 = vmul.f32 0.0078125, %v186_v39  ;;  %v394_v33 = vmul.f32 %v2218_v25, %v2218_v25  ;;  %v269_v37 = vmul.f32 0.0078125, %v188_v29  ;;  %v395_v45 = vmul.f32 %v2221_v42, %v2221_v42 }
  0xf7   :  { %v2228_v27 = vsub.f32 %v1945_v46, %v268_v28  ;;  %500 = vadd.xlane.f32.xlu1 %v393_v43  ;;  %502 = vadd.xlane.f32.xlu0 %v394_v33  ;;  %v2231_v44 = vsub.f32 %v1947_v47, %v269_v37 }
  0xf8   :  { %v190_v41 = vpop.xlane.xlu0 %189  ;;  %v192_v52 = vpop.xlane.xlu1 %191 }
  0xf9   :  { %3282 = vst [vmem:[#allocation28_spill] sm:$0xff] %v2228_v27  ;;  %3283 = vst [vmem:[#allocation29_spill] sm:$0xff] %v2231_v44  ;;  %v270_v31 = vmul.f32 0.0078125, %v190_v41  ;;  %v396_v35 = vmul.f32 %v2228_v27, %v2228_v27  ;;  %v271_v39 = vmul.f32 0.0078125, %v192_v52  ;;  %v397_v47 = vmul.f32 %v2231_v44, %v2231_v44 }
  0xfb   :  { %v2238_v29 = vsub.f32 %v1951_v48, %v270_v31  ;;  %504 = vadd.xlane.f32.xlu1 %v395_v45  ;;  %506 = vadd.xlane.f32.xlu0 %v396_v35  ;;  %v2241_v46 = vsub.f32 %v1953_v49, %v271_v39  ;;  %v3287_v48 = vld [vmem:[#allocation8_spill] sm:$0xff] }
  0xfc   :  { %v194_v43 = vpop.xlane.xlu0 %193  ;;  %v196_v28 = vpop.xlane.xlu1 %195 }
  0xfd   :  { %3284 = vst [vmem:[#allocation30_spill] sm:$0xff] %v2238_v29  ;;  %3285 = vst [vmem:[#allocation31_spill] sm:$0xff] %v2241_v46  ;;  %v272_v33 = vmul.f32 0.0078125, %v194_v43  ;;  %v398_v37 = vmul.f32 %v2238_v29, %v2238_v29  ;;  %v273_v41 = vmul.f32 0.0078125, %v196_v28  ;;  %v399_v49 = vmul.f32 %v2241_v46, %v2241_v46  ;;  %v3289_v29 = vld [vmem:[#allocation9_spill] sm:$0xff] }
  0xff   :  { %v2248_v52 = vsub.f32 %v1957_v50, %v272_v33  ;;  %508 = vadd.xlane.f32.xlu1 %v397_v47  ;;  %510 = vadd.xlane.f32.xlu0 %v398_v37  ;;  %v2251_v45 = vsub.f32 %v3287_v48, %v273_v41  ;;  %v3291_v50 = vld [vmem:[#allocation10_spill] sm:$0xff] }
 0x100   :  { %v198_v31 = vpop.xlane.xlu0 %197  ;;  %v200_v35 = vpop.xlane.xlu1 %199 }
 0x101   :  { %3286 = vst [vmem:[#allocation32_spill] sm:$0xff] %v2248_v52  ;;  %3288 = vst [vmem:[#allocation8_spill] sm:$0xff] %v2251_v45  ;;  %v274_v39 = vmul.f32 0.0078125, %v198_v31  ;;  %v400_v43 = vmul.f32 %v2248_v52, %v2248_v52  ;;  %v275_v44 = vmul.f32 0.0078125, %v200_v35  ;;  %v401_v33 = vmul.f32 %v2251_v45, %v2251_v45  ;;  %v3293_v52 = vld [vmem:[#allocation11_spill] sm:$0xff] }
 0x103   :  { %v2258_v28 = vsub.f32 %v3289_v29, %v274_v39  ;;  %512 = vadd.xlane.f32.xlu1 %v399_v49  ;;  %514 = vadd.xlane.f32.xlu0 %v400_v43  ;;  %v2261_v47 = vsub.f32 %v3291_v50, %v275_v44  ;;  %v3295_v29 = vld [vmem:[#allocation12_spill] sm:$0xff] }
 0x104   :  { %v202_v37 = vpop.xlane.xlu0 %201  ;;  %v204_v41 = vpop.xlane.xlu1 %203 }
 0x105   :  { %3290 = vst [vmem:[#allocation9_spill] sm:$0xff] %v2258_v28  ;;  %3292 = vst [vmem:[#allocation10_spill] sm:$0xff] %v2261_v47  ;;  %v276_v48 = vmul.f32 0.0078125, %v202_v37  ;;  %v402_v31 = vmul.f32 %v2258_v28, %v2258_v28  ;;  %v277_v46 = vmul.f32 0.0078125, %v204_v41  ;;  %v403_v44 = vmul.f32 %v2261_v47, %v2261_v47  ;;  %v3297_v28 = vld [vmem:[#allocation13_spill] sm:$0xff] }
 0x107   :  { %v2268_v35 = vsub.f32 %v3293_v52, %v276_v48  ;;  %516 = vadd.xlane.f32.xlu1 %v401_v33  ;;  %518 = vadd.xlane.f32.xlu0 %v402_v31  ;;  %v2271_v49 = vsub.f32 %v3295_v29, %v277_v46  ;;  %v3299_v52 = vld [vmem:[#allocation14_spill] sm:$0xff] }
 0x108   :  { %v206_v39 = vpop.xlane.xlu0 %205  ;;  %v208_v43 = vpop.xlane.xlu1 %207 }
 0x109   :  { %3294 = vst [vmem:[#allocation11_spill] sm:$0xff] %v2268_v35  ;;  %3296 = vst [vmem:[#allocation12_spill] sm:$0xff] %v2271_v49  ;;  %v278_v50 = vmul.f32 0.0078125, %v206_v39  ;;  %v404_v37 = vmul.f32 %v2268_v35, %v2268_v35  ;;  %v279_v45 = vmul.f32 0.0078125, %v208_v43  ;;  %v405_v46 = vmul.f32 %v2271_v49, %v2271_v49  ;;  %v3301_v35 = vld [vmem:[#allocation15_spill] sm:$0xff] }
 0x10b   :  { %v2278_v41 = vsub.f32 %v3297_v28, %v278_v50  ;;  %520 = vadd.xlane.f32.xlu1 %v403_v44  ;;  %522 = vadd.xlane.f32.xlu0 %v404_v37  ;;  %v2281_v33 = vsub.f32 %v3299_v52, %v279_v45  ;;  %v3303_v28 = vld [vmem:[#allocation16_spill] sm:$0xff] }
 0x10c   :  { %v210_v48 = vpop.xlane.xlu0 %209  ;;  %v212_v31 = vpop.xlane.xlu1 %211 }
 0x10d   :  { %3298 = vst [vmem:[#allocation13_spill] sm:$0xff] %v2278_v41  ;;  %3300 = vst [vmem:[#allocation14_spill] sm:$0xff] %v2281_v33  ;;  %v280_v29 = vmul.f32 0.0078125, %v210_v48  ;;  %v406_v39 = vmul.f32 %v2278_v41, %v2278_v41  ;;  %v281_v47 = vmul.f32 0.0078125, %v212_v31  ;;  %v407_v45 = vmul.f32 %v2281_v33, %v2281_v33  ;;  %v3305_v41 = vld [vmem:[#allocation17_spill] sm:$0xff] }
 0x10f   :  { %v2288_v43 = vsub.f32 %v3301_v35, %v280_v29  ;;  %524 = vadd.xlane.f32.xlu1 %v405_v46  ;;  %526 = vadd.xlane.f32.xlu0 %v406_v39  ;;  %v2291_v44 = vsub.f32 %v3303_v28, %v281_v47  ;;  %v3307_v35 = vld [vmem:[#allocation18_spill] sm:$0xff] }
 0x110   :  { %v214_v50 = vpop.xlane.xlu0 %213  ;;  %v216_v37 = vpop.xlane.xlu1 %215 }
 0x111   :  { %3302 = vst [vmem:[#allocation15_spill] sm:$0xff] %v2288_v43  ;;  %3304 = vst [vmem:[#allocation16_spill] sm:$0xff] %v2291_v44  ;;  %v282_v52 = vmul.f32 0.0078125, %v214_v50  ;;  %v408_v48 = vmul.f32 %v2288_v43, %v2288_v43  ;;  %v283_v49 = vmul.f32 0.0078125, %v216_v37  ;;  %v409_v47 = vmul.f32 %v2291_v44, %v2291_v44 }
 0x113   :  { %v2298_v31 = vsub.f32 %v3305_v41, %v282_v52  ;;  %528 = vadd.xlane.f32.xlu1 %v407_v45  ;;  %530 = vadd.xlane.f32.xlu0 %v408_v48  ;;  %v2301_v46 = vsub.f32 %v3307_v35, %v283_v49  ;;  %v3310_v41 = vld [vmem:[#allocation19_spill] sm:$0xff] }
 0x114   :  { %v218_v29 = vpop.xlane.xlu0 %217  ;;  %v220_v39 = vpop.xlane.xlu1 %219 }
 0x115   :  { %3306 = vst [vmem:[#allocation17_spill] sm:$0xff] %v2298_v31  ;;  %3308 = vst [vmem:[#allocation18_spill] sm:$0xff] %v2301_v46  ;;  %v284_v28 = vmul.f32 0.0078125, %v218_v29  ;;  %v410_v50 = vmul.f32 %v2298_v31, %v2298_v31  ;;  %v285_v33 = vmul.f32 0.0078125, %v220_v39  ;;  %v411_v49 = vmul.f32 %v2301_v46, %v2301_v46 }
 0x117   :  { %v2308_v37 = vsub.f32 %v1993_v62, %v284_v28  ;;  %532 = vadd.xlane.f32.xlu1 %v409_v47  ;;  %534 = vadd.xlane.f32.xlu0 %v410_v50  ;;  %v2311_v45 = vsub.f32 %v3310_v41, %v285_v33 }
 0x119   :  { %3309 = vst [vmem:[#allocation33_spill] sm:$0xff] %v2308_v37  ;;  %3311 = vst [vmem:[#allocation19_spill] sm:$0xff] %v2311_v45  ;;  %v412_v52 = vmul.f32 %v2308_v37, %v2308_v37  ;;  %v413_v48 = vmul.f32 %v2311_v45, %v2311_v45 }
 0x11b   :  { %536 = vadd.xlane.f32.xlu1 %v411_v49  ;;  %538 = vadd.xlane.f32.xlu0 %v412_v52 }
 0x11f   :  { %540 = vadd.xlane.f32.xlu1 %v413_v48 }
 0x128   :  { %v415_v35 = vpop.xlane.xlu0 %414 }
 0x129   :  { %v542_v62 = vmul.f32 0.007874016, %v415_v35 }
 0x12b   :  { %1475 = vrsqrt.f32 %v542_v62  ;;  %vm608_vm0 = vcmp.eq.f32.partialorder %v542_v62, inf  ;;  %vm610_vm1 = vcmp.eq.f32.partialorder %v542_v62, 0.0  ;;  %v611_v45 = vand.u32 2147483648, %v542_v62 }
 0x12c   :  { %v417_v47 = vpop.xlane.xlu1 %416  ;;  %v419_v29 = vpop.xlane.xlu0 %418 }
 0x12d   :  { %v543_v39 = vmul.f32 0.007874016, %v417_v47  ;;  %v2319_v33 = vmul.f32 0.007874016, %v419_v29 }
 0x12f   :  { %1477 = vrsqrt.f32 %v543_v39  ;;  %vm615_vm2 = vcmp.eq.f32.partialorder %v543_v39, inf  ;;  %vm617_vm3 = vcmp.eq.f32.partialorder %v543_v39, 0.0  ;;  %vm622_vm4 = vcmp.eq.f32.partialorder %v2319_v33, inf }
 0x130   :  { %1479 = vrsqrt.f32 %v2319_v33  ;;  %v421_v28 = vpop.xlane.xlu1 %420  ;;  %v423_v50 = vpop.xlane.xlu0 %422  ;;  %vm624_vm5 = vcmp.eq.f32.partialorder %v2319_v33, 0.0  ;;  %v625_v44 = vand.u32 2147483648, %v2319_v33 }
 0x131   :  { %v2322_v41 = vmul.f32 0.007874016, %v421_v28  ;;  %v2324_v49 = vmul.f32 0.007874016, %v423_v50 }
 0x133   :  { %1481 = vrsqrt.f32 %v2322_v41  ;;  %vm629_vm6 = vcmp.eq.f32.partialorder %v2322_v41, inf  ;;  %vm631_vm7 = vcmp.eq.f32.partialorder %v2322_v41, 0.0  ;;  %vm636_vm8 = vcmp.eq.f32.partialorder %v2324_v49, inf }
 0x134   :  { %1483 = vrsqrt.f32 %v2324_v49  ;;  %v425_v52 = vpop.xlane.xlu1 %424  ;;  %v427_v48 = vpop.xlane.xlu0 %426  ;;  %vm638_vm9 = vcmp.eq.f32.partialorder %v2324_v49, 0.0 }
 0x135   :  { %v2328_v35 = vmul.f32 0.007874016, %v425_v52  ;;  %v2330_v47 = vmul.f32 0.007874016, %v427_v48  ;;  %v618_v52 = vand.u32 2147483648, %v543_v39 }
 0x137   :  { %1485 = vrsqrt.f32 %v2328_v35  ;;  %vm643_vm10 = vcmp.eq.f32.partialorder %v2328_v35, inf  ;;  %vm645_vm11 = vcmp.eq.f32.partialorder %v2328_v35, 0.0  ;;  %v646_v38 = vand.u32 2147483648, %v2328_v35 }
 0x138   :  { %v1476_v29 = vpop.eup %1475  ;;  %1487 = vrsqrt.f32 %v2330_v47  ;;  %v429_v28 = vpop.xlane.xlu1 %428  ;;  %vm650_vm12 = vcmp.eq.f32.partialorder %v2330_v47, inf  ;;  %vm652_vm13 = vcmp.eq.f32.partialorder %v2330_v47, 0.0 }
 0x139   :  { %v431_v50 = vpop.xlane.xlu0 %430  ;;  %v607_v37 = vmul.f32 %v1476_v29, %v542_v62  ;;  %v2334_v46 = vmul.f32 0.007874016, %v429_v28  ;;  %v632_v28 = vand.u32 2147483648, %v2322_v41 }
 0x13a   :  { %v2336_v31 = vmul.f32 0.007874016, %v431_v50 }
 0x13b   :  { %v609_v48 = vsel %vm608_vm0, %v542_v62, %v607_v37  ;;  %1489 = vrsqrt.f32 %v2334_v46  ;;  %v639_v62 = vand.u32 2147483648, %v2324_v49  ;;  %vm657_vm14 = vcmp.eq.f32.partialorder %v2334_v46, inf }
 0x13c   :  { %v1478_v43 = vpop.eup %1477  ;;  %v612_v29 = vsel %vm610_vm1, %v611_v45, %v609_v48  ;;  %1491 = vrsqrt.f32 %v2336_v31  ;;  %v433_v50 = vpop.xlane.xlu1 %432  ;;  %vm659_vm15 = vcmp.eq.f32.partialorder %v2334_v46, 0.0  ;;  %vm664_vm0 = vcmp.eq.f32.partialorder %v2336_v31, inf }
 0x13d   :  { %v435_v27 = vpop.xlane.xlu0 %434  ;;  %v1480_v42 = vpop.eup %1479  ;;  %v1054_v25 = vadd.f32 1e-06, %v612_v29  ;;  %v614_v37 = vmul.f32 %v1478_v43, %v543_v39  ;;  %v2351_v45 = vmul.f32 0.007874016, %v433_v50  ;;  %vm666_vm1 = vcmp.eq.f32.partialorder %v2336_v31, 0.0 }
 0x13e   :  { %v621_v40 = vmul.f32 %v1480_v42, %v2319_v33  ;;  %v2353_v48 = vmul.f32 0.007874016, %v435_v27 }
 0x13f   :  { %1493 = vrcp.f32 %v1054_v25  ;;  %v616_v23 = vsel %vm615_vm2, %v543_v39, %v614_v37  ;;  %vm671_vm2 = vcmp.eq.f32.partialorder %v2351_v45, inf }
 0x140   :  { %v1482_v43 = vpop.eup %1481  ;;  %v619_v29 = vsel %vm617_vm3, %v618_v52, %v616_v23  ;;  %v623_v42 = vsel %vm622_vm4, %v2319_v33, %v621_v40  ;;  %1495 = vrsqrt.f32 %v2351_v45  ;;  %v437_v27 = vpop.xlane.xlu1 %436  ;;  %v653_v52 = vand.u32 2147483648, %v2330_v47 }
 0x141   :  { %v1484_v50 = vpop.eup %1483  ;;  %v1055_v25 = vadd.f32 1e-06, %v619_v29  ;;  %v626_v37 = vsel %vm624_vm5, %v625_v44, %v623_v42  ;;  %v628_v21 = vmul.f32 %v1482_v43, %v2322_v41  ;;  %1497 = vrsqrt.f32 %v2353_v48  ;;  %v439_v44 = vpop.xlane.xlu0 %438 }
 0x142   :  { %v1056_v39 = vadd.f32 1e-06, %v626_v37  ;;  %v635_v23 = vmul.f32 %v1484_v50, %v2324_v49  ;;  %v2385_v37 = vmul.f32 0.007874016, %v437_v27  ;;  %vm673_vm3 = vcmp.eq.f32.partialorder %v2351_v45, 0.0 }
 0x143   :  { %1499 = vrcp.f32 %v1055_v25  ;;  %v630_v40 = vsel %vm629_vm6, %v2322_v41, %v628_v21  ;;  %vm678_vm4 = vcmp.eq.f32.partialorder %v2353_v48, inf  ;;  %vm680_vm5 = vcmp.eq.f32.partialorder %v2353_v48, 0.0 }
 0x144   :  { %v1486_v33 = vpop.eup %1485  ;;  %1501 = vrcp.f32 %v1056_v39  ;;  %v633_v43 = vsel %vm631_vm7, %v632_v28, %v630_v40  ;;  %v637_v29 = vsel %vm636_vm8, %v2324_v49, %v635_v23  ;;  %v441_v36 = vpop.xlane.xlu1 %440  ;;  %v660_v28 = vand.u32 2147483648, %v2334_v46 }
 0x145   :  { %v1488_v42 = vpop.eup %1487  ;;  %v1057_v50 = vadd.f32 1e-06, %v633_v43  ;;  %v640_v21 = vsel %vm638_vm9, %v639_v62, %v637_v29  ;;  %v642_v25 = vmul.f32 %v1486_v33, %v2328_v35  ;;  %v2389_v40 = vmul.f32 0.007874016, %v439_v44 }
 0x146   :  { %v1058_v39 = vadd.f32 1e-06, %v640_v21  ;;  %v649_v41 = vmul.f32 %v1488_v42, %v2330_v47  ;;  %v2401_v44 = vmul.f32 0.007874016, %v441_v36  ;;  %vm685_vm6 = vcmp.eq.f32.partialorder %v2385_v37, inf }
 0x147   :  { %1503 = vrcp.f32 %v1057_v50  ;;  %v644_v23 = vsel %vm643_vm10, %v2328_v35, %v642_v25  ;;  %v443_v35 = vpop.xlane.xlu0 %442  ;;  %vm687_vm7 = vcmp.eq.f32.partialorder %v2385_v37, 0.0  ;;  %vm692_vm8 = vcmp.eq.f32.partialorder %v2389_v40, inf }
 0x148   :  { %v1490_v49 = vpop.eup %1489  ;;  %1505 = vrcp.f32 %v1058_v39  ;;  %v647_v62 = vsel %vm645_vm11, %v646_v38, %v644_v23  ;;  %v651_v27 = vsel %vm650_vm12, %v2330_v47, %v649_v41  ;;  %v667_v38 = vand.u32 2147483648, %v2336_v31 }
 0x149   :  { %v1492_v33 = vpop.eup %1491  ;;  %v1059_v43 = vadd.f32 1e-06, %v647_v62  ;;  %v654_v29 = vsel %vm652_vm13, %v653_v52, %v651_v27  ;;  %v656_v42 = vmul.f32 %v1490_v49, %v2334_v46  ;;  %1507 = vrsqrt.f32 %v2385_v37  ;;  %v2418_v52 = vld [vmem:[%s3221_s1] ss:$0 sm:$0xff] }
 0x14a   :  { %v1060_v50 = vadd.f32 1e-06, %v654_v29  ;;  %v663_v21 = vmul.f32 %v1492_v33, %v2336_v31  ;;  %1509 = vrsqrt.f32 %v2389_v40  ;;  %v674_v41 = vand.u32 2147483648, %v2351_v45  ;;  %v445_v33 = vpop.xlane.xlu1 %444 }
 0x14b   :  { %1511 = vrcp.f32 %v1059_v43  ;;  %v658_v36 = vsel %vm657_vm14, %v2334_v46, %v656_v42  ;;  %v2433_v46 = vld [vmem:[%s3222_s2] ss:$0 sm:$0xff]  ;;  %v2440_v42 = vmul.f32 0.007874016, %v443_v35  ;;  %vm694_vm9 = vcmp.eq.f32.partialorder %v2389_v40, 0.0 }
 0x14c   :  { %v1494_v47 = vpop.eup %1493  ;;  %1513 = vrcp.f32 %v1060_v50  ;;  %v661_v25 = vsel %vm659_vm15, %v660_v28, %v658_v36  ;;  %v665_v39 = vsel %vm664_vm0, %v2336_v31, %v663_v21  ;;  %v681_v31 = vand.u32 2147483648, %v2353_v48 }
 0x14d   :  { %v1496_v23 = vpop.eup %1495  ;;  %v1183_v49 = vmul.f32 %v1494_v47, %v2000_v55  ;;  %v1061_v62 = vadd.f32 1e-06, %v661_v25  ;;  %v668_v27 = vsel %vm666_vm1, %v667_v38, %v665_v39  ;;  %1515 = vrsqrt.f32 %v2401_v44  ;;  %v447_v47 = vpop.xlane.xlu0 %446 }
 0x14e   :  { %v1062_v28 = vadd.f32 1e-06, %v668_v27  ;;  %v670_v43 = vmul.f32 %v1496_v23, %v2351_v45  ;;  %v1498_v55 = vpop.eup %1497  ;;  %v2447_v36 = vmul.f32 0.007874016, %v445_v33  ;;  %vm699_vm10 = vcmp.eq.f32.partialorder %v2401_v44, inf }
 0x14f   :  { %v1253_v29 = vmul.f32 %v2418_v52, %v1183_v49  ;;  %1517 = vrcp.f32 %v1061_v62  ;;  %v677_v38 = vmul.f32 %v1498_v55, %v2353_v48  ;;  %v3312_v49 = vld [vmem:[#allocation20_spill] sm:$0xff]  ;;  %vm701_vm11 = vcmp.eq.f32.partialorder %v2401_v44, 0.0 }
 0x150   :  { %v1500_v50 = vpop.eup %1499  ;;  %1519 = vrcp.f32 %v1062_v28  ;;  %v672_v21 = vsel %vm671_vm2, %v2351_v45, %v670_v43  ;;  %v688_v45 = vand.u32 2147483648, %v2385_v37  ;;  %vm706_vm12 = vcmp.eq.f32.partialorder %v2440_v42, inf }
 0x151   :  { %v1502_v25 = vpop.eup %1501  ;;  %v1324_v39 = vadd.f32 %v2433_v46, %v1253_v29  ;;  %v1184_v23 = vmul.f32 %v1500_v50, %v2010_v57  ;;  %v675_v35 = vsel %vm673_vm3, %v674_v41, %v672_v21  ;;  %1521 = vrsqrt.f32 %v2440_v42 }
 0x152   :  { %v1185_v62 = vmul.f32 %v1502_v25, %v3312_v49  ;;  %v1063_v27 = vadd.f32 1e-06, %v675_v35  ;;  %v679_v28 = vsel %vm678_vm4, %v2353_v48, %v677_v38  ;;  %v2463_v41 = vmul.f32 0.007874016, %v447_v47  ;;  %v449_v48 = vpop.xlane.xlu1 %448 }
 0x153   :  { %1388 = vst [vmem:[#allocation5] sm:$0xff] %v1324_v39  ;;  %v1254_v33 = vmul.f32 %v2418_v52, %v1184_v23  ;;  %v682_v57 = vsel %vm680_vm5, %v681_v31, %v679_v28  ;;  %v695_v39 = vand.u32 2147483648, %v2389_v40  ;;  %v451_v28 = vpop.xlane.xlu0 %450  ;;  %vm708_vm13 = vcmp.eq.f32.partialorder %v2440_v42, 0.0 }
 0x154   :  { %v1504_v43 = vpop.eup %1503  ;;  %v1255_v55 = vmul.f32 %v2418_v52, %v1185_v62  ;;  %1523 = vrcp.f32 %v1063_v27  ;;  %v1064_v29 = vadd.f32 1e-06, %v682_v57  ;;  %vm713_vm14 = vcmp.eq.f32.partialorder %v2447_v36, inf }
 0x155   :  { %v1506_v50 = vpop.eup %1505  ;;  %v1325_v21 = vadd.f32 %v2433_v46, %v1254_v33  ;;  %v1186_v38 = vmul.f32 %v1504_v43, %v2013_v0  ;;  %1525 = vrsqrt.f32 %v2447_v36  ;;  %vm715_vm15 = vcmp.eq.f32.partialorder %v2447_v36, 0.0 }
 0x156   :  { %v1508_v31 = vpop.eup %1507  ;;  %v1326_v47 = vadd.f32 %v2433_v46, %v1255_v55  ;;  %v1187_v25 = vmul.f32 %v1506_v50, %v2020_v61  ;;  %1527 = vrcp.f32 %v1064_v29  ;;  %v702_v61 = vand.u32 2147483648, %v2401_v44 }
 0x157   :  { %v1510_v23 = vpop.eup %1509  ;;  %1389 = vst [vmem:[#allocation5 + $0x8] sm:$0xff] %v1325_v21  ;;  %v1256_v35 = vmul.f32 %v2418_v52, %v1186_v38  ;;  %v684_v49 = vmul.f32 %v1508_v31, %v2385_v37  ;;  %1529 = vrsqrt.f32 %v2463_v41  ;;  %v2487_v29 = vmul.f32 0.007874016, %v449_v48 }
 0x158   :  { %v1512_v0 = vpop.eup %1511  ;;  %1390 = vst [vmem:[#allocation5 + $0x10] sm:$0xff] %v1326_v47  ;;  %v1257_v62 = vmul.f32 %v2418_v52, %v1187_v25  ;;  %v691_v27 = vmul.f32 %v1510_v23, %v2389_v40  ;;  %vm720_vm0 = vcmp.eq.f32.partialorder %v2463_v41, inf  ;;  %vm722_vm1 = vcmp.eq.f32.partialorder %v2463_v41, 0.0 }
 0x159   :  { %v1514_v33 = vpop.eup %1513  ;;  %v1327_v57 = vadd.f32 %v2433_v46, %v1256_v35  ;;  %v1188_v43 = vmul.f32 %v1512_v0, %v2023_v2  ;;  %v686_v55 = vsel %vm685_vm6, %v2385_v37, %v684_v49  ;;  %v453_v35 = vpop.xlane.xlu1 %452  ;;  %1531 = vrsqrt.f32 %v2487_v29 }
 0x15a   :  { %v1516_v50 = vpop.eup %1515  ;;  %v1328_v21 = vadd.f32 %v2433_v46, %v1257_v62  ;;  %v1189_v38 = vmul.f32 %v1514_v33, %v2030_v1  ;;  %v689_v31 = vsel %vm687_vm7, %v688_v45, %v686_v55  ;;  %v693_v47 = vsel %vm692_vm8, %v2389_v40, %v691_v27 }
 0x15b   :  { %1391 = vst [vmem:[#allocation5 + $0x18] sm:$0xff] %v1327_v57  ;;  %v1258_v2 = vmul.f32 %v2418_v52, %v1188_v43  ;;  %v1065_v25 = vadd.f32 1e-06, %v689_v31  ;;  %v696_v48 = vsel %vm694_vm9, %v695_v39, %v693_v47  ;;  %v698_v23 = vmul.f32 %v1516_v50, %v2401_v44  ;;  %v455_v43 = vpop.xlane.xlu0 %454 }
 0x15c   :  { %v1518_v49 = vpop.eup %1517  ;;  %1392 = vst [vmem:[#allocation5 + $0x20] sm:$0xff] %v1328_v21  ;;  %v1259_v1 = vmul.f32 %v2418_v52, %v1189_v38  ;;  %v1066_v37 = vadd.f32 1e-06, %v696_v48  ;;  %v709_v38 = vand.u32 2147483648, %v2440_v42  ;;  %v2517_v31 = vmul.f32 0.007874016, %v451_v28 }
 0x15d   :  { %v1520_v45 = vpop.eup %1519  ;;  %v1329_v0 = vadd.f32 %v2433_v46, %v1258_v2  ;;  %v1190_v62 = vmul.f32 %v1518_v49, %v2033_v4  ;;  %1533 = vrcp.f32 %v1065_v25  ;;  %v700_v40 = vsel %vm699_vm10, %v2401_v44, %v698_v23  ;;  %v457_v2 = vpop.xlane.xlu1 %456 }
 0x15e   :  { %v1522_v39 = vpop.eup %1521  ;;  %v1330_v27 = vadd.f32 %v2433_v46, %v1259_v1  ;;  %v1191_v33 = vmul.f32 %v1520_v45, %v2040_v51  ;;  %1535 = vrcp.f32 %v1066_v37  ;;  %v703_v57 = vsel %vm701_vm11, %v702_v61, %v700_v40 }
 0x15f   :  { %1393 = vst [vmem:[#allocation5 + $0x28] sm:$0xff] %v1329_v0  ;;  %v1260_v55 = vmul.f32 %v2418_v52, %v1190_v62  ;;  %v1067_v50 = vadd.f32 1e-06, %v703_v57  ;;  %v705_v4 = vmul.f32 %v1522_v39, %v2440_v42  ;;  %v2519_v51 = vmul.f32 0.007874016, %v453_v35  ;;  %v459_v62 = vpop.xlane.xlu0 %458 }
 0x160   :  { %1394 = vst [vmem:[#allocation5 + $0x30] sm:$0xff] %v1330_v27  ;;  %v1261_v21 = vmul.f32 %v2418_v52, %v1191_v33  ;;  %v2531_v37 = vmul.f32 0.007874016, %v455_v43  ;;  %vm727_vm2 = vcmp.eq.f32.partialorder %v2487_v29, inf  ;;  %vm729_vm3 = vcmp.eq.f32.partialorder %v2487_v29, 0.0 }
 0x161   :  { %v1524_v44 = vpop.eup %1523  ;;  %v1331_v61 = vadd.f32 %v2433_v46, %v1260_v55  ;;  %1537 = vrcp.f32 %v1067_v50  ;;  %v707_v47 = vsel %vm706_vm12, %v2440_v42, %v705_v4  ;;  %v461_v50 = vpop.xlane.xlu1 %460  ;;  %vm734_vm4 = vcmp.eq.f32.partialorder %v2517_v31, inf }
 0x162   :  { %v1526_v25 = vpop.eup %1525  ;;  %v1332_v48 = vadd.f32 %v2433_v46, %v1261_v21  ;;  %v1192_v23 = vmul.f32 %v1524_v44, %v2043_v6  ;;  %v710_v28 = vsel %vm708_vm13, %v709_v38, %v707_v47  ;;  %1539 = vrsqrt.f32 %v2517_v31 }
 0x163   :  { %v1528_v35 = vpop.eup %1527  ;;  %1395 = vst [vmem:[#allocation5 + $0x38] sm:$0xff] %v1331_v61  ;;  %v1068_v49 = vadd.f32 1e-06, %v710_v28  ;;  %v712_v1 = vmul.f32 %v1526_v25, %v2447_v36  ;;  %v716_v6 = vand.u32 2147483648, %v2447_v36  ;;  %1541 = vrsqrt.f32 %v2519_v51  ;;  %v463_v25 = vpop.xlane.xlu0 %462 }
 0x164   :  { %v1530_v42 = vpop.eup %1529  ;;  %1396 = vst [vmem:[#allocation5 + $0x40] sm:$0xff] %v1332_v48  ;;  %v1262_v45 = vmul.f32 %v2418_v52, %v1192_v23  ;;  %v1193_v0 = vmul.f32 %v1528_v35, %v2050_v58  ;;  %v723_v58 = vand.u32 2147483648, %v2463_v41  ;;  %v2549_v44 = vmul.f32 0.007874016, %v457_v2 }
 0x165   :  { %1543 = vrcp.f32 %v1068_v49  ;;  %v714_v40 = vsel %vm713_vm14, %v2447_v36, %v712_v1  ;;  %v719_v39 = vmul.f32 %v1530_v42, %v2463_v41  ;;  %v730_v28 = vand.u32 2147483648, %v2487_v29 }
 0x166   :  { %v1333_v27 = vadd.f32 %v2433_v46, %v1262_v45  ;;  %v1263_v33 = vmul.f32 %v2418_v52, %v1193_v0  ;;  %v717_v57 = vsel %vm715_vm15, %v716_v6, %v714_v40  ;;  %1545 = vrsqrt.f32 %v2531_v37  ;;  %v1532_v21 = vpop.eup %1531 }
 0x167   :  { %v1069_v43 = vadd.f32 1e-06, %v717_v57  ;;  %v721_v55 = vsel %vm720_vm0, %v2463_v41, %v719_v39  ;;  %v726_v47 = vmul.f32 %v1532_v21, %v2487_v29  ;;  %v2554_v41 = vmul.f32 0.007874016, %v459_v62 }
 0x168   :  { %1397 = vst [vmem:[#allocation5 + $0x48] sm:$0xff] %v1333_v27  ;;  %v1334_v36 = vadd.f32 %v2433_v46, %v1263_v33  ;;  %v724_v4 = vsel %vm722_vm1, %v723_v58, %v721_v55  ;;  %v2558_v35 = vmul.f32 0.007874016, %v461_v50  ;;  %v2566_v45 = vmul.f32 0.007874016, %v463_v25 }
 0x169   :  { %1547 = vrcp.f32 %v1069_v43  ;;  %v1070_v38 = vadd.f32 1e-06, %v724_v4  ;;  %v728_v49 = vsel %vm727_vm2, %v2487_v29, %v726_v47  ;;  %vm736_vm5 = vcmp.eq.f32.partialorder %v2517_v31, 0.0 }
 0x16a   :  { %v1534_v61 = vpop.eup %1533  ;;  %1398 = vst [vmem:[#allocation5 + $0x50] sm:$0xff] %v1334_v36  ;;  %v731_v42 = vsel %vm729_vm3, %v730_v28, %v728_v49  ;;  %vm741_vm6 = vcmp.eq.f32.partialorder %v2519_v51, inf  ;;  %vm743_vm7 = vcmp.eq.f32.partialorder %v2519_v51, 0.0  ;;  %v744_v43 = vand.u32 2147483648, %v2519_v51 }
 0x16b   :  { %v1536_v48 = vpop.eup %1535  ;;  %v1194_v23 = vmul.f32 %v1534_v61, %v2053_v8  ;;  %1549 = vrcp.f32 %v1070_v38  ;;  %v465_v8 = vpop.xlane.xlu1 %464  ;;  %v1071_v62 = vadd.f32 1e-06, %v731_v42  ;;  %vm748_vm8 = vcmp.eq.f32.partialorder %v2531_v37, inf }
 0x16c   :  { %v1195_v2 = vmul.f32 %v1536_v48, %v2060_v54  ;;  %1551 = vrsqrt.f32 %v2549_v44  ;;  %v737_v54 = vand.u32 2147483648, %v2517_v31  ;;  %vm750_vm9 = vcmp.eq.f32.partialorder %v2531_v37, 0.0 }
 0x16d   :  { %v1264_v1 = vmul.f32 %v2418_v52, %v1194_v23  ;;  %1553 = vrsqrt.f32 %v2554_v41  ;;  %v751_v4 = vand.u32 2147483648, %v2531_v37  ;;  %vm755_vm10 = vcmp.eq.f32.partialorder %v2549_v44, inf }
 0x16e   :  { %v1538_v0 = vpop.eup %1537  ;;  %v1265_v6 = vmul.f32 %v2418_v52, %v1195_v2  ;;  %1555 = vrsqrt.f32 %v2558_v35  ;;  %v2593_v47 = vmul.f32 0.007874016, %v465_v8  ;;  %vm757_vm11 = vcmp.eq.f32.partialorder %v2549_v44, 0.0 }
 0x16f   :  { %v1540_v29 = vpop.eup %1539  ;;  %v1335_v40 = vadd.f32 %v2433_v46, %v1264_v1  ;;  %v1196_v39 = vmul.f32 %v1538_v0, %v2063_v10  ;;  %1557 = vrcp.f32 %v1071_v62  ;;  %v467_v10 = vpop.xlane.xlu0 %466  ;;  %v758_v8 = vand.u32 2147483648, %v2549_v44 }
 0x170   :  { %v1336_v27 = vadd.f32 %v2433_v46, %v1265_v6  ;;  %v733_v33 = vmul.f32 %v1540_v29, %v2517_v31  ;;  %v1542_v57 = vpop.eup %1541  ;;  %1559 = vrsqrt.f32 %v2566_v45  ;;  %v469_v25 = vpop.xlane.xlu1 %468  ;;  %v2599_v2 = vmul.f32 0.007874016, %v467_v10 }
 0x171   :  { %1399 = vst [vmem:[#allocation5 + $0x58] sm:$0xff] %v1335_v40  ;;  %v1266_v58 = vmul.f32 %v2418_v52, %v1196_v39  ;;  %v740_v36 = vmul.f32 %v1542_v57, %v2519_v51  ;;  %1561 = vrsqrt.f32 %v2593_v47  ;;  %v2607_v0 = vmul.f32 0.007874016, %v469_v25 }
 0x172   :  { %v1544_v55 = vpop.eup %1543  ;;  %1400 = vst [vmem:[#allocation5 + $0x60] sm:$0xff] %v1336_v27  ;;  %v735_v50 = vsel %vm734_vm4, %v2517_v31, %v733_v33  ;;  %vm762_vm12 = vcmp.eq.f32.partialorder %v2554_v41, inf  ;;  %vm764_vm13 = vcmp.eq.f32.partialorder %v2554_v41, 0.0  ;;  %v765_v40 = vand.u32 2147483648, %v2554_v41 }
 0x173   :  { %v1337_v21 = vadd.f32 %v2433_v46, %v1266_v58  ;;  %v1197_v38 = vmul.f32 %v1544_v55, %v2070_v59  ;;  %v738_v61 = vsel %vm736_vm5, %v737_v54, %v735_v50  ;;  %v1546_v48 = vpop.eup %1545  ;;  %v742_v28 = vsel %vm741_vm6, %v2519_v51, %v740_v36  ;;  %v471_v57 = vpop.xlane.xlu0 %470 }
 0x174   :  { %v1072_v23 = vadd.f32 1e-06, %v738_v61  ;;  %v745_v31 = vsel %vm743_vm7, %v744_v43, %v742_v28  ;;  %v747_v49 = vmul.f32 %v1546_v48, %v2531_v37  ;;  %vm769_vm14 = vcmp.eq.f32.partialorder %v2558_v35, inf  ;;  %v473_v55 = vpop.xlane.xlu1 %472 }
 0x175   :  { %1401 = vst [vmem:[#allocation5 + $0x68] sm:$0xff] %v1337_v21  ;;  %v1267_v59 = vmul.f32 %v2418_v52, %v1197_v38  ;;  %v1073_v42 = vadd.f32 1e-06, %v745_v31  ;;  %vm771_vm15 = vcmp.eq.f32.partialorder %v2558_v35, 0.0  ;;  %vm776_vm0 = vcmp.eq.f32.partialorder %v2566_v45, inf }
 0x176   :  { %v1548_v1 = vpop.eup %1547  ;;  %1563 = vrcp.f32 %v1072_v23  ;;  %v749_v51 = vsel %vm748_vm8, %v2531_v37, %v747_v49  ;;  %v2634_v21 = vmul.f32 0.007874016, %v471_v57  ;;  %vm778_vm1 = vcmp.eq.f32.partialorder %v2566_v45, 0.0 }
 0x177   :  { %v1338_v6 = vadd.f32 %v2433_v46, %v1267_v59  ;;  %v1198_v62 = vmul.f32 %v1548_v1, %v2073_v12  ;;  %1565 = vrcp.f32 %v1073_v42  ;;  %v752_v29 = vsel %vm750_vm9, %v751_v4, %v749_v51 }
 0x178   :  { %v1550_v54 = vpop.eup %1549  ;;  %v1074_v33 = vadd.f32 1e-06, %v752_v29  ;;  %1567 = vrsqrt.f32 %v2599_v2  ;;  %v772_v4 = vand.u32 2147483648, %v2558_v35  ;;  %vm783_vm2 = vcmp.eq.f32.partialorder %v2593_v47, inf }
 0x179   :  { %v1552_v39 = vpop.eup %1551  ;;  %1402 = vst [vmem:[#allocation5 + $0x70] sm:$0xff] %v1338_v6  ;;  %v1268_v27 = vmul.f32 %v2418_v52, %v1198_v62  ;;  %v1199_v12 = vmul.f32 %v1550_v54, %v2080_v53  ;;  %1569 = vrsqrt.f32 %v2607_v0  ;;  %v477_v54 = vpop.xlane.xlu1 %476  ;;  %vm785_vm3 = vcmp.eq.f32.partialorder %v2593_v47, 0.0 }
 0x17a   :  { %v1554_v58 = vpop.eup %1553  ;;  %v754_v43 = vmul.f32 %v1552_v39, %v2549_v44  ;;  %1571 = vrcp.f32 %v1074_v33  ;;  %vm790_vm4 = vcmp.eq.f32.partialorder %v2599_v2, inf  ;;  %vm792_vm5 = vcmp.eq.f32.partialorder %v2599_v2, 0.0 }
 0x17b   :  { %v1339_v37 = vadd.f32 %v2433_v46, %v1268_v27  ;;  %v1269_v10 = vmul.f32 %v2418_v52, %v1199_v12  ;;  %v761_v53 = vmul.f32 %v1554_v58, %v2554_v41  ;;  %v1556_v50 = vpop.eup %1555  ;;  %1573 = vrsqrt.f32 %v2634_v21 }
 0x17c   :  { %v756_v36 = vsel %vm755_vm10, %v2549_v44, %v754_v43  ;;  %v1558_v38 = vpop.eup %1557  ;;  %v768_v23 = vmul.f32 %v1556_v50, %v2558_v35  ;;  %v2661_v27 = vmul.f32 0.007874016, %v473_v55  ;;  %v786_v58 = vand.u32 2147483648, %v2593_v47 }
 0x17d   :  { %1403 = vst [vmem:[#allocation5 + $0x78] sm:$0xff] %v1339_v37  ;;  %v1340_v61 = vadd.f32 %v2433_v46, %v1269_v10  ;;  %v759_v25 = vsel %vm757_vm11, %v758_v8, %v756_v36  ;;  %v763_v48 = vsel %vm762_vm12, %v2554_v41, %v761_v53  ;;  %v1560_v28 = vpop.eup %1559  ;;  %v1200_v59 = vmul.f32 %v1558_v38, %v2083_v14  ;;  %v475_v8 = vpop.xlane.xlu0 %474 }
 0x17e   :  { %v1075_v31 = vadd.f32 1e-06, %v759_v25  ;;  %v766_v49 = vsel %vm764_vm13, %v765_v40, %v763_v48  ;;  %v770_v44 = vsel %vm769_vm14, %v2558_v35, %v768_v23  ;;  %v775_v42 = vmul.f32 %v1560_v28, %v2566_v45  ;;  %v1562_v29 = vpop.eup %1561 }
 0x17f   :  { %1404 = vst [vmem:[#allocation5 + $0x80] sm:$0xff] %v1340_v61  ;;  %v1076_v1 = vadd.f32 1e-06, %v766_v49  ;;  %v1270_v6 = vmul.f32 %v2418_v52, %v1200_v59  ;;  %v773_v14 = vsel %vm771_vm15, %v772_v4, %v770_v44  ;;  %v779_v41 = vand.u32 2147483648, %v2566_v45  ;;  %v481_v49 = vpop.xlane.xlu1 %480 }
 0x180   :  { %1575 = vrcp.f32 %v1075_v31  ;;  %v1077_v62 = vadd.f32 1e-06, %v773_v14  ;;  %v777_v51 = vsel %vm776_vm0, %v2566_v45, %v775_v42  ;;  %v2663_v12 = vmul.f32 0.007874016, %v475_v8 }
 0x181   :  { %1577 = vrcp.f32 %v1076_v1  ;;  %v1341_v40 = vadd.f32 %v2433_v46, %v1270_v6  ;;  %v780_v39 = vsel %vm778_vm1, %v779_v41, %v777_v51  ;;  %v782_v57 = vmul.f32 %v1562_v29, %v2593_v47  ;;  %v479_v36 = vpop.xlane.xlu0 %478 }
 0x182   :  { %1579 = vrcp.f32 %v1077_v62  ;;  %v1078_v33 = vadd.f32 1e-06, %v780_v39  ;;  %v2670_v43 = vmul.f32 0.007874016, %v477_v54  ;;  %v793_v25 = vand.u32 2147483648, %v2599_v2 }
 0x183   :  { %v1564_v35 = vpop.eup %1563  ;;  %1405 = vst [vmem:[#allocation5 + $0x88] sm:$0xff] %v1341_v40  ;;  %1581 = vrsqrt.f32 %v2661_v27  ;;  %v784_v10 = vsel %vm783_vm2, %v2593_v47, %v782_v57  ;;  %vm797_vm6 = vcmp.eq.f32.partialorder %v2607_v0, inf  ;;  %v800_v31 = vand.u32 2147483648, %v2607_v0 }
 0x184   :  { %v1201_v45 = vmul.f32 %v1564_v35, %v2090_v60  ;;  %v1566_v37 = vpop.eup %1565  ;;  %1583 = vrcp.f32 %v1078_v33  ;;  %v787_v50 = vsel %vm785_vm3, %v786_v58, %v784_v10  ;;  %vm799_vm7 = vcmp.eq.f32.partialorder %v2607_v0, 0.0 }
 0x185   :  { %v1568_v53 = vpop.eup %1567  ;;  %v1202_v60 = vmul.f32 %v1566_v37, %v2093_v16  ;;  %1585 = vrsqrt.f32 %v2663_v12  ;;  %v1079_v38 = vadd.f32 1e-06, %v787_v50  ;;  %vm804_vm8 = vcmp.eq.f32.partialorder %v2634_v21, inf  ;;  %v485_v37 = vpop.xlane.xlu1 %484 }
 0x186   :  { %v1271_v55 = vmul.f32 %v2418_v52, %v1201_v45  ;;  %v1570_v4 = vpop.eup %1569  ;;  %v789_v61 = vmul.f32 %v1568_v53, %v2599_v2  ;;  %1587 = vrsqrt.f32 %v2670_v43  ;;  %v2700_v51 = vmul.f32 0.007874016, %v479_v36 }
 0x187   :  { %v1572_v47 = vpop.eup %1571  ;;  %v1272_v23 = vmul.f32 %v2418_v52, %v1202_v60  ;;  %v796_v28 = vmul.f32 %v1570_v4, %v2607_v0  ;;  %1589 = vrcp.f32 %v1079_v38  ;;  %v2702_v54 = vmul.f32 0.007874016, %v481_v49 }
 0x188   :  { %v1342_v48 = vadd.f32 %v2433_v46, %v1271_v55  ;;  %v1203_v16 = vmul.f32 %v1572_v47, %v2100_v56  ;;  %v791_v59 = vsel %vm790_vm4, %v2599_v2, %v789_v61  ;;  %v1574_v8 = vpop.eup %1573  ;;  %v483_v2 = vpop.xlane.xlu0 %482  ;;  %vm806_vm9 = vcmp.eq.f32.partialorder %v2634_v21, 0.0 }
 0x189   :  { %v1343_v1 = vadd.f32 %v2433_v46, %v1272_v23  ;;  %v794_v44 = vsel %vm792_vm5, %v793_v25, %v791_v59  ;;  %v798_v42 = vsel %vm797_vm6, %v2607_v0, %v796_v28  ;;  %v803_v62 = vmul.f32 %v1574_v8, %v2634_v21 }
 0x18a   :  { %1406 = vst [vmem:[#allocation5 + $0x90] sm:$0xff] %v1342_v48  ;;  %v1273_v56 = vmul.f32 %v2418_v52, %v1203_v16  ;;  %v1080_v6 = vadd.f32 1e-06, %v794_v44  ;;  %v801_v14 = vsel %vm799_vm7, %v800_v31, %v798_v42  ;;  %v807_v0 = vand.u32 2147483648, %v2634_v21 }
 0x18b   :  { %1407 = vst [vmem:[#allocation5 + $0x98] sm:$0xff] %v1343_v1  ;;  %v1081_v41 = vadd.f32 1e-06, %v801_v14  ;;  %v805_v33 = vsel %vm804_vm8, %v2634_v21, %v803_v62  ;;  %vm811_vm10 = vcmp.eq.f32.partialorder %v2661_v27, inf  ;;  %v2712_v58 = vmul.f32 0.007874016, %v483_v2 }
 0x18c   :  { %v1344_v40 = vadd.f32 %v2433_v46, %v1273_v56  ;;  %1591 = vrcp.f32 %v1080_v6  ;;  %v808_v45 = vsel %vm806_vm9, %v807_v0, %v805_v33  ;;  %vm813_vm11 = vcmp.eq.f32.partialorder %v2661_v27, 0.0  ;;  %v487_v61 = vpop.xlane.xlu0 %486  ;;  %v489_v56 = vpop.xlane.xlu1 %488 }
 0x18d   :  { %v1576_v29 = vpop.eup %1575  ;;  %1593 = vrcp.f32 %v1081_v41  ;;  %v1082_v55 = vadd.f32 1e-06, %v808_v45  ;;  %vm818_vm12 = vcmp.eq.f32.partialorder %v2663_v12, inf  ;;  %v2723_v38 = vmul.f32 0.007874016, %v485_v37 }
 0x18e   :  { %v1578_v39 = vpop.eup %1577  ;;  %v1204_v35 = vmul.f32 %v1576_v29, %v2103_v18  ;;  %1408 = vst [vmem:[#allocation5 + $0xa0] sm:$0xff] %v1344_v40  ;;  %1595 = vrsqrt.f32 %v2700_v51  ;;  %vm820_vm13 = vcmp.eq.f32.partialorder %v2663_v12, 0.0  ;;  %v821_v16 = vand.u32 2147483648, %v2663_v12 }
 0x18f   :  { %v1205_v57 = vmul.f32 %v1578_v39, %v2110_v3  ;;  %v1580_v10 = vpop.eup %1579  ;;  %1597 = vrsqrt.f32 %v2702_v54  ;;  %v814_v3 = vand.u32 2147483648, %v2661_v27  ;;  %vm825_vm14 = vcmp.eq.f32.partialorder %v2670_v43, inf }
 0x190   :  { %v1274_v53 = vmul.f32 %v2418_v52, %v1204_v35  ;;  %v1582_v18 = vpop.eup %1581  ;;  %v1206_v60 = vmul.f32 %v1580_v10, %v2113_v20  ;;  %1599 = vrcp.f32 %v1082_v55  ;;  %v828_v41 = vand.u32 2147483648, %v2670_v43  ;;  %v491_v29 = vpop.xlane.xlu0 %490 }
 0x191   :  { %v1275_v21 = vmul.f32 %v2418_v52, %v1205_v57  ;;  %v1584_v50 = vpop.eup %1583  ;;  %v810_v4 = vmul.f32 %v1582_v18, %v2661_v27  ;;  %1601 = vrsqrt.f32 %v2712_v58  ;;  %vm827_vm15 = vcmp.eq.f32.partialorder %v2670_v43, 0.0  ;;  %v493_v55 = vpop.xlane.xlu1 %492 }
 0x192   :  { %v1345_v36 = vadd.f32 %v2433_v46, %v1274_v53  ;;  %v1586_v25 = vpop.eup %1585  ;;  %v1276_v48 = vmul.f32 %v2418_v52, %v1206_v60  ;;  %v1207_v20 = vmul.f32 %v1584_v50, %v2120_v5  ;;  %1603 = vrsqrt.f32 %v2723_v38 }
 0x193   :  { %v1346_v47 = vadd.f32 %v2433_v46, %v1275_v21  ;;  %v812_v23 = vsel %vm811_vm10, %v2661_v27, %v810_v4  ;;  %v817_v28 = vmul.f32 %v1586_v25, %v2663_v12  ;;  %v1588_v59 = vpop.eup %1587  ;;  %vm832_vm0 = vcmp.eq.f32.partialorder %v2700_v51, inf }
 0x194   :  { %1409 = vst [vmem:[#allocation5 + $0xa8] sm:$0xff] %v1345_v36  ;;  %v1347_v31 = vadd.f32 %v2433_v46, %v1276_v48  ;;  %v1277_v49 = vmul.f32 %v2418_v52, %v1207_v20  ;;  %v815_v5 = vsel %vm813_vm11, %v814_v3, %v812_v23  ;;  %v1590_v1 = vpop.eup %1589  ;;  %v824_v8 = vmul.f32 %v1588_v59, %v2670_v43  ;;  %v495_v23 = vpop.xlane.xlu0 %494 }
 0x195   :  { %1410 = vst [vmem:[#allocation5 + $0xb0] sm:$0xff] %v1346_v47  ;;  %v1083_v44 = vadd.f32 1e-06, %v815_v5  ;;  %v819_v42 = vsel %vm818_vm12, %v2663_v12, %v817_v28  ;;  %v1208_v14 = vmul.f32 %v1590_v1, %v2123_v22  ;;  %v2754_v39 = vmul.f32 0.007874016, %v487_v61  ;;  %v497_v5 = vpop.xlane.xlu1 %496 }
 0x196   :  { %1411 = vst [vmem:[#allocation5 + $0xb8] sm:$0xff] %v1347_v31  ;;  %v1348_v6 = vadd.f32 %v2433_v46, %v1277_v49  ;;  %v822_v27 = vsel %vm820_vm13, %v821_v16, %v819_v42  ;;  %v826_v2 = vsel %vm825_vm14, %v2670_v43, %v824_v8  ;;  %vm834_vm1 = vcmp.eq.f32.partialorder %v2700_v51, 0.0 }
 0x197   :  { %1605 = vrcp.f32 %v1083_v44  ;;  %v1084_v62 = vadd.f32 1e-06, %v822_v27  ;;  %v1278_v40 = vmul.f32 %v2418_v52, %v1208_v14  ;;  %v829_v0 = vsel %vm827_vm15, %v828_v41, %v826_v2 }
 0x198   :  { %1412 = vst [vmem:[#allocation5 + $0xc0] sm:$0xff] %v1348_v6  ;;  %v1085_v12 = vadd.f32 1e-06, %v829_v0  ;;  %v2757_v35 = vmul.f32 0.007874016, %v489_v56  ;;  %v835_v53 = vand.u32 2147483648, %v2700_v51  ;;  %v499_v0 = vpop.xlane.xlu0 %498 }
 0x199   :  { %v1592_v22 = vpop.eup %1591  ;;  %1607 = vrcp.f32 %v1084_v62  ;;  %v1349_v57 = vadd.f32 %v2433_v46, %v1278_v40  ;;  %v2762_v45 = vmul.f32 0.007874016, %v491_v29  ;;  %vm839_vm2 = vcmp.eq.f32.partialorder %v2702_v54, inf }
 0x19a   :  { %v1594_v33 = vpop.eup %1593  ;;  %v1209_v43 = vmul.f32 %v1592_v22, %v2130_v7  ;;  %1609 = vrsqrt.f32 %v2754_v39  ;;  %vm841_vm3 = vcmp.eq.f32.partialorder %v2702_v54, 0.0  ;;  %v842_v3 = vand.u32 2147483648, %v2702_v54 }
 0x19b   :  { %v1596_v37 = vpop.eup %1595  ;;  %v1210_v10 = vmul.f32 %v1594_v33, %v2133_v24  ;;  %1611 = vrcp.f32 %v1085_v12  ;;  %1413 = vst [vmem:[#allocation5 + $0xc8] sm:$0xff] %v1349_v57  ;;  %vm846_vm4 = vcmp.eq.f32.partialorder %v2712_v58, inf  ;;  %vm848_vm5 = vcmp.eq.f32.partialorder %v2712_v58, 0.0 }
 0x19c   :  { %v1598_v18 = vpop.eup %1597  ;;  %v1279_v21 = vmul.f32 %v2418_v52, %v1209_v43  ;;  %v831_v60 = vmul.f32 %v1596_v37, %v2700_v51  ;;  %1613 = vrsqrt.f32 %v2757_v35  ;;  %v849_v31 = vand.u32 2147483648, %v2712_v58  ;;  %v501_v37 = vpop.xlane.xlu1 %500 }
 0x19d   :  { %v1280_v7 = vmul.f32 %v2418_v52, %v1210_v10  ;;  %v838_v24 = vmul.f32 %v1598_v18, %v2702_v54  ;;  %v1600_v50 = vpop.eup %1599  ;;  %1615 = vrsqrt.f32 %v2762_v45  ;;  %vm853_vm6 = vcmp.eq.f32.partialorder %v2723_v38, inf }
 0x19e   :  { %v1350_v36 = vadd.f32 %v2433_v46, %v1279_v21  ;;  %v833_v4 = vsel %vm832_vm0, %v2700_v51, %v831_v60  ;;  %v1602_v61 = vpop.eup %1601  ;;  %v1211_v47 = vmul.f32 %v1600_v50, %v2140_v9  ;;  %v2794_v51 = vmul.f32 0.007874016, %v493_v55 }
 0x19f   :  { %v1351_v25 = vadd.f32 %v2433_v46, %v1280_v7  ;;  %v836_v48 = vsel %vm834_vm1, %v835_v53, %v833_v4  ;;  %v840_v20 = vsel %vm839_vm2, %v2702_v54, %v838_v24  ;;  %v845_v59 = vmul.f32 %v1602_v61, %v2712_v58  ;;  %v1604_v1 = vpop.eup %1603 }
 0x1a0   :  { %1414 = vst [vmem:[#allocation5 + $0xd0] sm:$0xff] %v1350_v36  ;;  %v1086_v28 = vadd.f32 1e-06, %v836_v48  ;;  %v843_v16 = vsel %vm841_vm3, %v842_v3, %v840_v20  ;;  %v1281_v9 = vmul.f32 %v2418_v52, %v1211_v47  ;;  %vm855_vm7 = vcmp.eq.f32.partialorder %v2723_v38, 0.0 }
 0x1a1   :  { %1415 = vst [vmem:[#allocation5 + $0xd8] sm:$0xff] %v1351_v25  ;;  %v1087_v49 = vadd.f32 1e-06, %v843_v16  ;;  %v847_v54 = vsel %vm846_vm4, %v2712_v58, %v845_v59  ;;  %v2800_v44 = vmul.f32 0.007874016, %v495_v23  ;;  %v852_v56 = vmul.f32 %v1604_v1, %v2723_v38  ;;  %v503_v25 = vpop.xlane.xlu0 %502  ;;  %v505_v23 = vpop.xlane.xlu1 %504 }
 0x1a2   :  { %1617 = vrcp.f32 %v1086_v28  ;;  %v1352_v42 = vadd.f32 %v2433_v46, %v1281_v9  ;;  %v850_v8 = vsel %vm848_vm5, %v849_v31, %v847_v54  ;;  %v856_v27 = vand.u32 2147483648, %v2723_v38  ;;  %v2870_v54 = vld [vmem:[%s3221_s1] ss:$0 sm:$0xff] }
 0x1a3   :  { %1619 = vrcp.f32 %v1087_v49  ;;  %v1088_v14 = vadd.f32 1e-06, %v850_v8  ;;  %v2808_v41 = vmul.f32 0.007874016, %v497_v5  ;;  %v854_v2 = vsel %vm853_vm6, %v2723_v38, %v852_v56 }
 0x1a4   :  { %v1606_v6 = vpop.eup %1605  ;;  %1621 = vrsqrt.f32 %v2794_v51  ;;  %1416 = vst [vmem:[#allocation5 + $0xe0] sm:$0xff] %v1352_v42  ;;  %vm860_vm8 = vcmp.eq.f32.partialorder %v2754_v39, inf  ;;  %v857_v29 = vsel %vm855_vm7, %v856_v27, %v854_v2  ;;  %vm862_vm9 = vcmp.eq.f32.partialorder %v2754_v39, 0.0  ;;  %v2883_v27 = vld [vmem:[%s3222_s2] ss:$0 sm:$0xff]  ;;  %s1780_s2 = smov [#allocation5]  }
 0x1a5   :  { %v1212_v62 = vmul.f32 %v1606_v6, %v2143_v26  ;;  %1623 = vrsqrt.f32 %v2800_v44  ;;  %v863_v40 = vand.u32 2147483648, %v2754_v39  ;;  %v1089_v33 = vadd.f32 1e-06, %v857_v29  ;;  %s1457_s25 = sshll.u32 %s1780_s2, 4  ;;  %s1458_s25 = int_to_ptr.vmem [resolvable:$true] %s1457_s25 }
 0x1a6   :  { %v1608_v58 = vpop.eup %1607  ;;  %1625 = vrcp.f32 %v1088_v14  ;;  %vm867_vm10 = vcmp.eq.f32.partialorder %v2757_v35, inf  ;;  %vm869_vm11 = vcmp.eq.f32.partialorder %v2757_v35, 0.0  ;;  %v870_v38 = vand.u32 2147483648, %v2757_v35  ;;  %s1753_s26 = scalar_lea.vmem %s1458_s25, 8192  ;;  %p1758_p6 = scmp.lt.s32.totalorder %s1458_s25, %s1458_s25 }
 0x1a7   :  { %v1610_v22 = vpop.eup %1609  ;;  %v1282_v26 = vmul.f32 %v2418_v52, %v1212_v62  ;;  %v1213_v12 = vmul.f32 %v1608_v58, %v2148_v11  ;;  %1627 = vrsqrt.f32 %v2808_v41  ;;  %vm874_vm12 = vcmp.eq.f32.partialorder %v2762_v45, inf  ;;  %p1754_p5 = scmp.ne.s32.totalorder %s1458_s25, %s1753_s26  ;;  %p1759_p7 = scmp.lt.s32.totalorder %s1753_s26, %s1753_s26 }
 0x1a8   :  { %v1612_v57 = vpop.eup %1611  ;;  %v859_v43 = vmul.f32 %v1610_v22, %v2754_v39  ;;  %1629 = vrcp.f32 %v1089_v33  ;;  %v2835_v60 = vmul.f32 0.007874016, %v499_v0  ;;  %v2841_v50 = vmul.f32 0.007874016, %v501_v37 }
 0x1a9   :  { %v1614_v10 = vpop.eup %1613  ;;  %v1353_v53 = vadd.f32 %v2433_v46, %v1282_v26  ;;  %v1283_v55 = vmul.f32 %v2418_v52, %v1213_v12  ;;  %v1214_v11 = vmul.f32 %v1612_v57, %v2151_v63  ;;  %vm876_vm13 = vcmp.eq.f32.partialorder %v2762_v45, 0.0  ;;  %p1760_p8 = por %p1759_p7, %p1758_p6 }
 0x1aa   :  { %v861_v18 = vsel %vm860_vm8, %v2754_v39, %v859_v43  ;;  %v866_v21 = vmul.f32 %v1614_v10, %v2757_v35  ;;  %v1616_v7 = vpop.eup %1615  ;;  %1631 = vrsqrt.f32 %v2835_v60  ;;  %v877_v39 = vand.u32 2147483648, %v2762_v45 }
 0x1ab   :  { %1417 = vst [vmem:[#allocation5 + $0xe8] sm:$0xff] %v1353_v53  ;;  %v1354_v24 = vadd.f32 %v2433_v46, %v1283_v55  ;;  %v1284_v3 = vmul.f32 %v2418_v52, %v1214_v11  ;;  %v864_v63 = vsel %vm862_vm9, %v863_v40, %v861_v18  ;;  %v873_v61 = vmul.f32 %v1616_v7, %v2762_v45  ;;  %v509_v40 = vpop.xlane.xlu1 %508  ;;  %p1761_p9 = pnand %p1760_p8, %p1754_p5 }
 0x1ac   :  { %v1090_v36 = vadd.f32 1e-06, %v864_v63  ;;  %v868_v4 = vsel %vm867_vm10, %v2757_v35, %v866_v21  ;;  %vm881_vm14 = vcmp.eq.f32.partialorder %v2794_v51, inf  ;;  %vm883_vm15 = vcmp.eq.f32.partialorder %v2794_v51, 0.0 }
 0x1ad   :  { %1418 = vst [vmem:[#allocation5 + $0xf0] sm:$0xff] %v1354_v24  ;;  %v1355_v47 = vadd.f32 %v2433_v46, %v1284_v3  ;;  %v871_v52 = vsel %vm869_vm11, %v870_v38, %v868_v4  ;;  %v875_v20 = vsel %vm874_vm12, %v2762_v45, %v873_v61  ;;  %v884_v46 = vand.u32 2147483648, %v2794_v51 }
 0x1ae   :  { %1633 = vrcp.f32 %v1090_v36  ;;  %v1091_v48 = vadd.f32 1e-06, %v871_v52  ;;  %v878_v16 = vsel %vm876_vm13, %v877_v39, %v875_v20  ;;  %vm888_vm0 = vcmp.eq.f32.partialorder %v2800_v44, inf }
 0x1af   :  { %v1618_v28 = vpop.eup %1617  ;;  %1419 = vst [vmem:[#allocation5 + $0xf8] sm:$0xff] %v1355_v47  ;;  %1635 = vrsqrt.f32 %v2841_v50  ;;  %v1092_v31 = vadd.f32 1e-06, %v878_v16  ;;  %vm890_vm1 = vcmp.eq.f32.partialorder %v2800_v44, 0.0  ;;  %v891_v49 = vand.u32 2147483648, %v2800_v44  ;;  %v513_v36 = vpop.xlane.xlu1 %512 }
 0x1b0   :  { %v1620_v35 = vpop.eup %1619  ;;  %v1215_v59 = vmul.f32 %v1618_v28, %v2158_v13  ;;  %1637 = vrcp.f32 %v1091_v48  ;;  %v2865_v5 = vmul.f32 0.007874016, %v503_v25  ;;  %vm895_vm2 = vcmp.eq.f32.partialorder %v2808_v41, inf }
 0x1b1   :  { %v1622_v45 = vpop.eup %1621  ;;  %v1216_v9 = vmul.f32 %v1620_v35, %v2161_v30  ;;  %1639 = vrcp.f32 %v1092_v31  ;;  %v507_v30 = vpop.xlane.xlu0 %506  ;;  %v2878_v14 = vmul.f32 0.007874016, %v505_v23  ;;  %v898_v29 = vand.u32 2147483648, %v2808_v41 }
 0x1b2   :  { %v1624_v1 = vpop.eup %1623  ;;  %v1285_v13 = vmul.f32 %v2870_v54, %v1215_v59  ;;  %v880_v42 = vmul.f32 %v1622_v45, %v2794_v51  ;;  %1641 = vrsqrt.f32 %v2865_v5  ;;  %v2897_v33 = vmul.f32 0.007874016, %v507_v30 }
 0x1b3   :  { %v1626_v8 = vpop.eup %1625  ;;  %v1286_v56 = vmul.f32 %v2870_v54, %v1216_v9  ;;  %v887_v6 = vmul.f32 %v1624_v1, %v2800_v44  ;;  %1643 = vrsqrt.f32 %v2878_v14  ;;  %v2905_v53 = vmul.f32 0.007874016, %v509_v40 }
 0x1b4   :  { %v1356_v62 = vadd.f32 %v2883_v27, %v1285_v13  ;;  %v1217_v2 = vmul.f32 %v1626_v8, %v2168_v15  ;;  %v882_v58 = vsel %vm881_vm14, %v2794_v51, %v880_v42  ;;  %v1628_v0 = vpop.eup %1627  ;;  %vm897_vm3 = vcmp.eq.f32.partialorder %v2808_v41, 0.0  ;;  %v517_v42 = vpop.xlane.xlu1 %516 }
 0x1b5   :  { %v1357_v22 = vadd.f32 %v2883_v27, %v1286_v56  ;;  %v885_v26 = vsel %vm883_vm15, %v884_v46, %v882_v58  ;;  %v889_v12 = vsel %vm888_vm0, %v2800_v44, %v887_v6  ;;  %v1630_v15 = vpop.eup %1629  ;;  %v894_v37 = vmul.f32 %v1628_v0, %v2808_v41  ;;  %v511_v44 = vpop.xlane.xlu0 %510 }
 0x1b6   :  { %1420 = vst [vmem:[#allocation5 + $0x100] sm:$0xff] %v1356_v62  ;;  %v1287_v57 = vmul.f32 %v2870_v54, %v1217_v2  ;;  %v1093_v43 = vadd.f32 1e-06, %v885_v26  ;;  %v892_v38 = vsel %vm890_vm1, %v891_v49, %v889_v12  ;;  %v1218_v51 = vmul.f32 %v1630_v15, %v2171_v32  ;;  %v3313_v12 = vld [vmem:[#allocation21_spill] sm:$0xff] }
 0x1b7   :  { %1421 = vst [vmem:[#allocation5 + $0x108] sm:$0xff] %v1357_v22  ;;  %v1094_v10 = vadd.f32 1e-06, %v892_v38  ;;  %v896_v11 = vsel %vm895_vm2, %v2808_v41, %v894_v37  ;;  %v1632_v18 = vpop.eup %1631  ;;  %vm902_vm4 = vcmp.eq.f32.partialorder %v2835_v60, inf  ;;  %vm904_vm5 = vcmp.eq.f32.partialorder %v2835_v60, 0.0 }
 0x1b8   :  { %v1358_v55 = vadd.f32 %v2883_v27, %v1287_v57  ;;  %1645 = vrcp.f32 %v1093_v43  ;;  %v1288_v21 = vmul.f32 %v2870_v54, %v1218_v51  ;;  %v899_v32 = vsel %vm897_vm3, %v898_v29, %v896_v11  ;;  %v3314_v43 = vld [vmem:[#allocation22_spill] sm:$0xff] }
 0x1b9   :  { %1647 = vrcp.f32 %v1094_v10  ;;  %v1095_v7 = vadd.f32 1e-06, %v899_v32  ;;  %v901_v24 = vmul.f32 %v1632_v18, %v2835_v60  ;;  %v905_v41 = vand.u32 2147483648, %v2835_v60  ;;  %v515_v16 = vpop.xlane.xlu0 %514 }
 0x1ba   :  { %1422 = vst [vmem:[#allocation5 + $0x110] sm:$0xff] %v1358_v55  ;;  %1649 = vrsqrt.f32 %v2897_v33  ;;  %v1359_v63 = vadd.f32 %v2883_v27, %v1288_v21  ;;  %vm909_vm6 = vcmp.eq.f32.partialorder %v2841_v50, inf  ;;  %vm911_vm7 = vcmp.eq.f32.partialorder %v2841_v50, 0.0 }
 0x1bb   :  { %v1634_v3 = vpop.eup %1633  ;;  %1651 = vrsqrt.f32 %v2905_v53  ;;  %v903_v25 = vsel %vm902_vm4, %v2835_v60, %v901_v24  ;;  %v912_v48 = vand.u32 2147483648, %v2841_v50  ;;  %vm916_vm8 = vcmp.eq.f32.partialorder %v2865_v5, inf  ;;  %v521_v24 = vpop.xlane.xlu1 %520 }
 0x1bc   :  { %v1636_v4 = vpop.eup %1635  ;;  %v1219_v61 = vmul.f32 %v1634_v3, %v2178_v17  ;;  %1653 = vrcp.f32 %v1095_v7  ;;  %1423 = vst [vmem:[#allocation5 + $0x118] sm:$0xff] %v1359_v63  ;;  %v906_v52 = vsel %vm904_vm5, %v905_v41, %v903_v25  ;;  %v2929_v17 = vmul.f32 0.007874016, %v511_v44  ;;  %v3315_v63 = vld [vmem:[#allocation23_spill] sm:$0xff] }
 0x1bd   :  { %v1638_v47 = vpop.eup %1637  ;;  %v908_v39 = vmul.f32 %v1636_v4, %v2841_v50  ;;  %v1096_v28 = vadd.f32 1e-06, %v906_v52  ;;  %vm918_vm9 = vcmp.eq.f32.partialorder %v2865_v5, 0.0  ;;  %v919_v35 = vand.u32 2147483648, %v2865_v5  ;;  %v519_v22 = vpop.xlane.xlu0 %518 }
 0x1be   :  { %v1289_v20 = vmul.f32 %v2870_v54, %v1219_v61  ;;  %v1220_v23 = vmul.f32 %v1638_v47, %v2181_v34  ;;  %v1640_v60 = vpop.eup %1639  ;;  %v2936_v59 = vmul.f32 0.007874016, %v513_v36  ;;  %v2945_v13 = vmul.f32 0.007874016, %v515_v16 }
 0x1bf   :  { %v910_v46 = vsel %vm909_vm6, %v2841_v50, %v908_v39  ;;  %v1642_v31 = vpop.eup %1641  ;;  %v1221_v9 = vmul.f32 %v1640_v60, %v2188_v19  ;;  %1655 = vrcp.f32 %v1096_v28  ;;  %vm923_vm10 = vcmp.eq.f32.partialorder %v2878_v14, inf }
 0x1c0   :  { %v1360_v45 = vadd.f32 %v2883_v27, %v1289_v20  ;;  %v1290_v34 = vmul.f32 %v2870_v54, %v1220_v23  ;;  %v913_v49 = vsel %vm911_vm7, %v912_v48, %v910_v46  ;;  %v915_v1 = vmul.f32 %v1642_v31, %v2865_v5  ;;  %v1644_v6 = vpop.eup %1643  ;;  %v3316_v46 = vld [vmem:[#allocation24_spill] sm:$0xff] }
 0x1c1   :  { %1657 = vrsqrt.f32 %v2929_v17  ;;  %v1291_v8 = vmul.f32 %v2870_v54, %v1221_v9  ;;  %v1097_v56 = vadd.f32 1e-06, %v913_v49  ;;  %vm925_vm11 = vcmp.eq.f32.partialorder %v2878_v14, 0.0  ;;  %v523_v25 = vpop.xlane.xlu0 %522 }
 0x1c2   :  { %1424 = vst [vmem:[#allocation5 + $0x120] sm:$0xff] %v1360_v45  ;;  %v1361_v30 = vadd.f32 %v2883_v27, %v1290_v34  ;;  %v917_v19 = vsel %vm916_vm8, %v2865_v5, %v915_v1  ;;  %v926_v50 = vand.u32 2147483648, %v2878_v14  ;;  %1659 = vrsqrt.f32 %v2936_v59  ;;  %v525_v45 = vpop.xlane.xlu1 %524 }
 0x1c3   :  { %v1362_v62 = vadd.f32 %v2883_v27, %v1291_v8  ;;  %1661 = vrcp.f32 %v1097_v56  ;;  %v920_v2 = vsel %vm918_vm9, %v919_v35, %v917_v19  ;;  %v2959_v58 = vmul.f32 0.007874016, %v517_v42  ;;  %v3317_v19 = vld [vmem:[#allocation25_spill] sm:$0xff] }
 0x1c4   :  { %1425 = vst [vmem:[#allocation5 + $0x128] sm:$0xff] %v1361_v30  ;;  %v1098_v40 = vadd.f32 1e-06, %v920_v2  ;;  %v922_v0 = vmul.f32 %v1644_v6, %v2878_v14  ;;  %vm930_vm12 = vcmp.eq.f32.partialorder %v2897_v33, inf  ;;  %1663 = vrsqrt.f32 %v2945_v13 }
 0x1c5   :  { %v1646_v29 = vpop.eup %1645  ;;  %1426 = vst [vmem:[#allocation5 + $0x130] sm:$0xff] %v1362_v62  ;;  %vm932_vm13 = vcmp.eq.f32.partialorder %v2897_v33, 0.0  ;;  %v933_v5 = vand.u32 2147483648, %v2897_v33  ;;  %vm937_vm14 = vcmp.eq.f32.partialorder %v2905_v53, inf  ;;  %vm939_vm15 = vcmp.eq.f32.partialorder %v2905_v53, 0.0 }
 0x1c6   :  { %v1648_v26 = vpop.eup %1647  ;;  %v1222_v15 = vmul.f32 %v1646_v29, %v3313_v12  ;;  %1665 = vrcp.f32 %v1098_v40  ;;  %v924_v37 = vsel %vm923_vm10, %v2878_v14, %v922_v0  ;;  %v940_v7 = vand.u32 2147483648, %v2905_v53  ;;  %v527_v0 = vpop.xlane.xlu0 %526 }
 0x1c7   :  { %v1650_v57 = vpop.eup %1649  ;;  %v1223_v38 = vmul.f32 %v1648_v26, %v3314_v43  ;;  %v927_v55 = vsel %vm925_vm11, %v926_v50, %v924_v37  ;;  %1667 = vrsqrt.f32 %v2959_v58  ;;  %vm944_vm0 = vcmp.eq.f32.partialorder %v2929_v17, inf  ;;  %v529_v37 = vpop.xlane.xlu1 %528 }
 0x1c8   :  { %v1652_v51 = vpop.eup %1651  ;;  %v1292_v10 = vmul.f32 %v2870_v54, %v1222_v15  ;;  %v929_v11 = vmul.f32 %v1650_v57, %v2897_v33  ;;  %v1099_v21 = vadd.f32 1e-06, %v927_v55  ;;  %v2996_v48 = vmul.f32 0.007874016, %v519_v22 }
 0x1c9   :  { %v1654_v44 = vpop.eup %1653  ;;  %v1293_v18 = vmul.f32 %v2870_v54, %v1223_v38  ;;  %v936_v32 = vmul.f32 %v1652_v51, %v2905_v53  ;;  %vm946_vm1 = vcmp.eq.f32.partialorder %v2929_v17, 0.0  ;;  %v3000_v28 = vmul.f32 0.007874016, %v521_v24 }
 0x1ca   :  { %v1363_v3 = vadd.f32 %v2883_v27, %v1292_v10  ;;  %v1224_v41 = vmul.f32 %v1654_v44, %v3315_v63  ;;  %v931_v14 = vsel %vm930_vm12, %v2897_v33, %v929_v11  ;;  %1669 = vrcp.f32 %v1099_v21  ;;  %v531_v63 = vpop.xlane.xlu0 %530 }
 0x1cb   :  { %v1364_v36 = vadd.f32 %v2883_v27, %v1293_v18  ;;  %v934_v4 = vsel %vm932_vm13, %v933_v5, %v931_v14  ;;  %v938_v61 = vsel %vm937_vm14, %v2905_v53, %v936_v32  ;;  %v947_v33 = vand.u32 2147483648, %v2929_v17  ;;  %v3318_v5 = vld [vmem:[#allocation26_spill] sm:$0xff] }
 0x1cc   :  { %1427 = vst [vmem:[#allocation5 + $0x138] sm:$0xff] %v1363_v3  ;;  %v1294_v47 = vmul.f32 %v2870_v54, %v1224_v41  ;;  %v1100_v52 = vadd.f32 1e-06, %v934_v4  ;;  %v941_v39 = vsel %vm939_vm15, %v940_v7, %v938_v61  ;;  %v1656_v20 = vpop.eup %1655  ;;  %v3004_v31 = vmul.f32 0.007874016, %v523_v25  ;;  %v3319_v7 = vld [vmem:[#allocation27_spill] sm:$0xff]  ;;  %v533_v61 = vpop.xlane.xlu1 %532 }
 0x1cd   :  { %1428 = vst [vmem:[#allocation5 + $0x140] sm:$0xff] %v1364_v36  ;;  %v1101_v23 = vadd.f32 1e-06, %v941_v39  ;;  %v1225_v35 = vmul.f32 %v1656_v20, %v3316_v46  ;;  %vm951_vm2 = vcmp.eq.f32.partialorder %v2936_v59, inf  ;;  %vm953_vm3 = vcmp.eq.f32.partialorder %v2936_v59, 0.0 }
 0x1ce   :  { %v1658_v16 = vpop.eup %1657  ;;  %v1365_v60 = vadd.f32 %v2883_v27, %v1294_v47  ;;  %1671 = vrcp.f32 %v1100_v52  ;;  %v954_v49 = vand.u32 2147483648, %v2936_v59  ;;  %vm958_vm4 = vcmp.eq.f32.partialorder %v2945_v13, inf  ;;  %v3320_v47 = vld [vmem:[#allocation28_spill] sm:$0xff] }
 0x1cf   :  { %1673 = vrcp.f32 %v1101_v23  ;;  %v943_v53 = vmul.f32 %v1658_v16, %v2929_v17  ;;  %v1660_v34 = vpop.eup %1659  ;;  %v1295_v9 = vmul.f32 %v2870_v54, %v1225_v35  ;;  %vm960_vm5 = vcmp.eq.f32.partialorder %v2945_v13, 0.0 }
 0x1d0   :  { %1429 = vst [vmem:[#allocation5 + $0x148] sm:$0xff] %v1365_v60  ;;  %1675 = vrsqrt.f32 %v2996_v48  ;;  %v1662_v1 = vpop.eup %1661  ;;  %v950_v30 = vmul.f32 %v1660_v34, %v2936_v59  ;;  %v961_v40 = vand.u32 2147483648, %v2945_v13  ;;  %vm965_vm6 = vcmp.eq.f32.partialorder %v2959_v58, inf }
 0x1d1   :  { %v945_v42 = vsel %vm944_vm0, %v2929_v17, %v943_v53  ;;  %1677 = vrsqrt.f32 %v3000_v28  ;;  %v1664_v8 = vpop.eup %1663  ;;  %v1366_v56 = vadd.f32 %v2883_v27, %v1295_v9  ;;  %v1226_v50 = vmul.f32 %v1662_v1, %v3317_v19 }
 0x1d2   :  { %v948_v6 = vsel %vm946_vm1, %v947_v33, %v945_v42  ;;  %1679 = vrsqrt.f32 %v3004_v31  ;;  %v952_v2 = vsel %vm951_vm2, %v2936_v59, %v950_v30  ;;  %v957_v29 = vmul.f32 %v1664_v8, %v2945_v13  ;;  %v3321_v33 = vld [vmem:[#allocation29_spill] sm:$0xff] }
 0x1d3   :  { %v1102_v62 = vadd.f32 1e-06, %v948_v6  ;;  %v1666_v22 = vpop.eup %1665  ;;  %1430 = vst [vmem:[#allocation5 + $0x150] sm:$0xff] %v1366_v56  ;;  %v1296_v26 = vmul.f32 %v2870_v54, %v1226_v50  ;;  %v955_v17 = vsel %vm953_vm3, %v954_v49, %v952_v2  ;;  %v968_v12 = vand.u32 2147483648, %v2959_v58  ;;  %v535_v56 = vpop.xlane.xlu0 %534 }
 0x1d4   :  { %v1668_v15 = vpop.eup %1667  ;;  %v1227_v57 = vmul.f32 %v1666_v22, %v3318_v5  ;;  %v1103_v43 = vadd.f32 1e-06, %v955_v17  ;;  %v959_v38 = vsel %vm958_vm4, %v2945_v13, %v957_v29  ;;  %v3042_v55 = vmul.f32 0.007874016, %v525_v45  ;;  %v537_v17 = vpop.xlane.xlu1 %536 }
 0x1d5   :  { %1681 = vrcp.f32 %v1102_v62  ;;  %v1367_v51 = vadd.f32 %v2883_v27, %v1296_v26  ;;  %v962_v59 = vsel %vm960_vm5, %v961_v40, %v959_v38  ;;  %v964_v10 = vmul.f32 %v1668_v15, %v2959_v58 }
 0x1d6   :  { %v1297_v11 = vmul.f32 %v2870_v54, %v1227_v57  ;;  %1683 = vrcp.f32 %v1103_v43  ;;  %v1104_v44 = vadd.f32 1e-06, %v962_v59  ;;  %v3045_v18 = vmul.f32 0.007874016, %v527_v0  ;;  %v3323_v43 = vld [vmem:[#allocation31_spill] sm:$0xff] }
 0x1d7   :  { %v1670_v21 = vpop.eup %1669  ;;  %1431 = vst [vmem:[#allocation5 + $0x158] sm:$0xff] %v1367_v51  ;;  %v966_v32 = vsel %vm965_vm6, %v2959_v58, %v964_v10  ;;  %vm967_vm7 = vcmp.eq.f32.partialorder %v2959_v58, 0.0  ;;  %1685 = vrsqrt.f32 %v3042_v55  ;;  %vm972_vm8 = vcmp.eq.f32.partialorder %v2996_v48, inf  ;;  %v539_v10 = vpop.xlane.xlu0 %538 }
 0x1d8   :  { %v1368_v13 = vadd.f32 %v2883_v27, %v1297_v11  ;;  %v1228_v24 = vmul.f32 %v1670_v21, %v3319_v7  ;;  %1687 = vrcp.f32 %v1104_v44  ;;  %v969_v3 = vsel %vm967_vm7, %v968_v12, %v966_v32  ;;  %v3324_v32 = vld [vmem:[#allocation32_spill] sm:$0xff] }
 0x1d9   :  { %v1105_v41 = vadd.f32 1e-06, %v969_v3  ;;  %vm974_vm9 = vcmp.eq.f32.partialorder %v2996_v48, 0.0  ;;  %1689 = vrsqrt.f32 %v3045_v18  ;;  %v975_v36 = vand.u32 2147483648, %v2996_v48 }
 0x1da   :  { %1432 = vst [vmem:[#allocation5 + $0x160] sm:$0xff] %v1368_v13  ;;  %v1298_v58 = vmul.f32 %v2870_v54, %v1228_v24  ;;  %vm979_vm10 = vcmp.eq.f32.partialorder %v3000_v28, inf  ;;  %v3060_v4 = vmul.f32 0.007874016, %v529_v37  ;;  %vm981_vm11 = vcmp.eq.f32.partialorder %v3000_v28, 0.0 }
 0x1db   :  { %v1672_v14 = vpop.eup %1671  ;;  %1691 = vrcp.f32 %v1105_v41  ;;  %v3064_v39 = vmul.f32 0.007874016, %v531_v63  ;;  %v982_v60 = vand.u32 2147483648, %v3000_v28  ;;  %vm986_vm12 = vcmp.eq.f32.partialorder %v3004_v31, inf }
 0x1dc   :  { %v1674_v25 = vpop.eup %1673  ;;  %v1229_v52 = vmul.f32 %v1672_v14, %v3320_v47  ;;  %v1369_v23 = vadd.f32 %v2883_v27, %v1298_v58  ;;  %1693 = vrsqrt.f32 %v3060_v4  ;;  %v3073_v45 = vmul.f32 0.007874016, %v533_v61 }
 0x1dd   :  { %v1676_v20 = vpop.eup %1675  ;;  %v1230_v16 = vmul.f32 %v1674_v25, %v3321_v33  ;;  %vm988_vm13 = vcmp.eq.f32.partialorder %v3004_v31, 0.0  ;;  %1695 = vrsqrt.f32 %v3064_v39  ;;  %v989_v8 = vand.u32 2147483648, %v3004_v31  ;;  %v3325_v25 = vld [vmem:[#allocation8_spill] sm:$0xff] }
 0x1de   :  { %v1678_v46 = vpop.eup %1677  ;;  %v1299_v35 = vmul.f32 %v2870_v54, %v1229_v52  ;;  %v971_v53 = vmul.f32 %v1676_v20, %v2996_v48  ;;  %1433 = vst [vmem:[#allocation5 + $0x168] sm:$0xff] %v1369_v23  ;;  %vm993_vm14 = vcmp.eq.f32.partialorder %v3042_v55, inf  ;;  %1697 = vrsqrt.f32 %v3073_v45 }
 0x1df   :  { %v1680_v34 = vpop.eup %1679  ;;  %v1300_v9 = vmul.f32 %v2870_v54, %v1230_v16  ;;  %v978_v49 = vmul.f32 %v1678_v46, %v3000_v28  ;;  %vm995_vm15 = vcmp.eq.f32.partialorder %v3042_v55, 0.0  ;;  %v996_v15 = vand.u32 2147483648, %v3042_v55 }
 0x1e0   :  { %v1370_v1 = vadd.f32 %v2883_v27, %v1299_v35  ;;  %v973_v42 = vsel %vm972_vm8, %v2996_v48, %v971_v53  ;;  %v985_v30 = vmul.f32 %v1680_v34, %v3004_v31  ;;  %v3322_v48 = vld [vmem:[#allocation30_spill] sm:$0xff]  ;;  %vm1000_vm0 = vcmp.eq.f32.partialorder %v3045_v18, inf }
 0x1e1   :  { %v1371_v19 = vadd.f32 %v2883_v27, %v1300_v9  ;;  %v976_v50 = vsel %vm974_vm9, %v975_v36, %v973_v42  ;;  %v980_v6 = vsel %vm979_vm10, %v3000_v28, %v978_v49  ;;  %v3106_v37 = vmul.f32 0.007874016, %v535_v56 }
 0x1e2   :  { %v1682_v62 = vpop.eup %1681  ;;  %1434 = vst [vmem:[#allocation5 + $0x170] sm:$0xff] %v1370_v1  ;;  %v1106_v2 = vadd.f32 1e-06, %v976_v50  ;;  %v983_v29 = vsel %vm981_vm11, %v982_v60, %v980_v6  ;;  %v987_v40 = vsel %vm986_vm12, %v3004_v31, %v985_v30  ;;  %vm1002_vm1 = vcmp.eq.f32.partialorder %v3045_v18, 0.0 }
 0x1e3   :  { %1435 = vst [vmem:[#allocation5 + $0x178] sm:$0xff] %v1371_v19  ;;  %v1231_v0 = vmul.f32 %v1682_v62, %v3322_v48  ;;  %v1107_v22 = vadd.f32 1e-06, %v983_v29  ;;  %v990_v26 = vsel %vm988_vm13, %v989_v8, %v987_v40  ;;  %v1684_v12 = vpop.eup %1683  ;;  %v3110_v59 = vmul.f32 0.007874016, %v537_v17  ;;  %v3326_v29 = vld [vmem:[#allocation9_spill] sm:$0xff] }
 0x1e4   :  { %1699 = vrcp.f32 %v1106_v2  ;;  %v1108_v28 = vadd.f32 1e-06, %v990_v26  ;;  %v1686_v5 = vpop.eup %1685  ;;  %v1232_v38 = vmul.f32 %v1684_v12, %v3323_v43  ;;  %v1003_v3 = vand.u32 2147483648, %v3045_v18 }
 0x1e5   :  { %v1301_v57 = vmul.f32 %v2870_v54, %v1231_v0  ;;  %1701 = vrcp.f32 %v1107_v22  ;;  %v1688_v31 = vpop.eup %1687  ;;  %v992_v51 = vmul.f32 %v1686_v5, %v3042_v55  ;;  %vm1007_vm2 = vcmp.eq.f32.partialorder %v3060_v4, inf  ;;  %v3327_v0 = vld [vmem:[#allocation10_spill] sm:$0xff] }
 0x1e6   :  { %1703 = vrcp.f32 %v1108_v28  ;;  %v1690_v11 = vpop.eup %1689  ;;  %v1302_v21 = vmul.f32 %v2870_v54, %v1232_v38  ;;  %v1233_v13 = vmul.f32 %v1688_v31, %v3324_v32  ;;  %v3126_v36 = vmul.f32 0.007874016, %v539_v10  ;;  %v3328_v28 = vld [vmem:[#allocation11_spill] sm:$0xff] }
 0x1e7   :  { %v1372_v44 = vadd.f32 %v2883_v27, %v1301_v57  ;;  %1705 = vrsqrt.f32 %v3106_v37  ;;  %v994_v7 = vsel %vm993_vm14, %v3042_v55, %v992_v51  ;;  %v999_v24 = vmul.f32 %v1690_v11, %v3045_v18 }
 0x1e8   :  { %v1692_v63 = vpop.eup %1691  ;;  %v1373_v41 = vadd.f32 %v2883_v27, %v1302_v21  ;;  %v1303_v14 = vmul.f32 %v2870_v54, %v1233_v13  ;;  %v997_v58 = vsel %vm995_vm15, %v996_v15, %v994_v7  ;;  %1707 = vrsqrt.f32 %v3110_v59 }
 0x1e9   :  { %1436 = vst [vmem:[#allocation5 + $0x180] sm:$0xff] %v1372_v44  ;;  %v1694_v61 = vpop.eup %1693  ;;  %v1234_v47 = vmul.f32 %v1692_v63, %v3325_v25  ;;  %v1109_v52 = vadd.f32 1e-06, %v997_v58  ;;  %v1001_v20 = vsel %vm1000_vm0, %v3045_v18, %v999_v24  ;;  %vm1009_vm3 = vcmp.eq.f32.partialorder %v3060_v4, 0.0  ;;  %v541_v18 = vpop.xlane.xlu1 %540  ;;  %v3329_v63 = vld [vmem:[#allocation12_spill] sm:$0xff] }
 0x1ea   :  { %1437 = vst [vmem:[#allocation5 + $0x188] sm:$0xff] %v1373_v41  ;;  %v1374_v23 = vadd.f32 %v2883_v27, %v1303_v14  ;;  %v1004_v33 = vsel %vm1002_vm1, %v1003_v3, %v1001_v20  ;;  %v1006_v55 = vmul.f32 %v1694_v61, %v3060_v4  ;;  %v1696_v16 = vpop.eup %1695  ;;  %v1010_v35 = vand.u32 2147483648, %v3060_v4 }
 0x1eb   :  { %v1304_v60 = vmul.f32 %v2870_v54, %v1234_v47  ;;  %1709 = vrcp.f32 %v1109_v52  ;;  %v1110_v46 = vadd.f32 1e-06, %v1004_v33  ;;  %v1013_v34 = vmul.f32 %v1696_v16, %v3064_v39  ;;  %v1698_v42 = vpop.eup %1697  ;;  %v3330_v47 = vld [vmem:[#allocation13_spill] sm:$0xff] }
 0x1ec   :  { %1438 = vst [vmem:[#allocation5 + $0x190] sm:$0xff] %v1374_v23  ;;  %v1008_v53 = vsel %vm1007_vm2, %v3060_v4, %v1006_v55  ;;  %vm1014_vm4 = vcmp.eq.f32.partialorder %v3064_v39, inf  ;;  %1711 = vrsqrt.f32 %v3126_v36  ;;  %v1017_v1 = vand.u32 2147483648, %v3064_v39 }
 0x1ed   :  { %v1375_v9 = vadd.f32 %v2883_v27, %v1304_v60  ;;  %1713 = vrcp.f32 %v1110_v46  ;;  %v1011_v49 = vsel %vm1009_vm3, %v1010_v35, %v1008_v53  ;;  %v1015_v8 = vsel %vm1014_vm4, %v3064_v39, %v1013_v34  ;;  %v3331_v35 = vld [vmem:[#allocation14_spill] sm:$0xff] }
 0x1ee   :  { %v1111_v30 = vadd.f32 1e-06, %v1011_v49  ;;  %vm1016_vm5 = vcmp.eq.f32.partialorder %v3064_v39, 0.0  ;;  %v1020_v56 = vmul.f32 %v1698_v42, %v3073_v45  ;;  %v3151_v19 = vmul.f32 0.007874016, %v541_v18 }
 0x1ef   :  { %1439 = vst [vmem:[#allocation5 + $0x198] sm:$0xff] %v1375_v9  ;;  %v1018_v4 = vsel %vm1016_vm5, %v1017_v1, %v1015_v8  ;;  %vm1021_vm6 = vcmp.eq.f32.partialorder %v3073_v45, inf  ;;  %v1024_v62 = vand.u32 2147483648, %v3073_v45  ;;  %vm1023_vm7 = vcmp.eq.f32.partialorder %v3073_v45, 0.0  ;;  %v3332_v1 = vld [vmem:[#allocation15_spill] sm:$0xff] }
 0x1f0   :  { %1715 = vrcp.f32 %v1111_v30  ;;  %v1112_v6 = vadd.f32 1e-06, %v1018_v4  ;;  %v1022_v48 = vsel %vm1021_vm6, %v3073_v45, %v1020_v56  ;;  %vm1028_vm8 = vcmp.eq.f32.partialorder %v3106_v37, inf }
 0x1f1   :  { %v1700_v50 = vpop.eup %1699  ;;  %1717 = vrsqrt.f32 %v3151_v19  ;;  %v1025_v26 = vsel %vm1023_vm7, %v1024_v62, %v1022_v48  ;;  %v1031_v31 = vand.u32 2147483648, %v3106_v37  ;;  %vm1030_vm9 = vcmp.eq.f32.partialorder %v3106_v37, 0.0  ;;  %v3333_v62 = vld [vmem:[#allocation16_spill] sm:$0xff] }
 0x1f2   :  { %v1702_v2 = vpop.eup %1701  ;;  %v1235_v40 = vmul.f32 %v1700_v50, %v3326_v29  ;;  %1719 = vrcp.f32 %v1112_v6  ;;  %v1113_v5 = vadd.f32 1e-06, %v1025_v26  ;;  %vm1035_vm10 = vcmp.eq.f32.partialorder %v3110_v59, inf }
 0x1f3   :  { %v1704_v39 = vpop.eup %1703  ;;  %v1236_v22 = vmul.f32 %v1702_v2, %v3327_v0  ;;  %v1038_v24 = vand.u32 2147483648, %v3110_v59  ;;  %vm1037_vm11 = vcmp.eq.f32.partialorder %v3110_v59, 0.0  ;;  %vm1042_vm12 = vcmp.eq.f32.partialorder %v3126_v36, inf }
 0x1f4   :  { %v1706_v17 = vpop.eup %1705  ;;  %v1305_v12 = vmul.f32 %v2870_v54, %v1235_v40  ;;  %v1237_v15 = vmul.f32 %v1704_v39, %v3328_v28  ;;  %1721 = vrcp.f32 %v1113_v5  ;;  %v1045_v23 = vand.u32 2147483648, %v3126_v36 }
 0x1f5   :  { %v1306_v57 = vmul.f32 %v2870_v54, %v1236_v22  ;;  %v1027_v43 = vmul.f32 %v1706_v17, %v3106_v37  ;;  %v1708_v51 = vpop.eup %1707  ;;  %vm1044_vm13 = vcmp.eq.f32.partialorder %v3126_v36, 0.0  ;;  %vm1049_vm14 = vcmp.eq.f32.partialorder %v3151_v19, inf }
 0x1f6   :  { %v1376_v45 = vadd.f32 %v2883_v27, %v1305_v12  ;;  %v1307_v38 = vmul.f32 %v2870_v54, %v1237_v15  ;;  %v1034_v32 = vmul.f32 %v1708_v51, %v3110_v59  ;;  %v1052_v30 = vand.u32 2147483648, %v3151_v19  ;;  %v3335_v12 = vld [vmem:[#allocation18_spill] sm:$0xff] }
 0x1f7   :  { %v1377_v10 = vadd.f32 %v2883_v27, %v1306_v57  ;;  %v1029_v11 = vsel %vm1028_vm8, %v3106_v37, %v1027_v43  ;;  %vm1051_vm15 = vcmp.eq.f32.partialorder %v3151_v19, 0.0  ;;  %v3336_v43 = vld [vmem:[#allocation33_spill] sm:$0xff] }
 0x1f8   :  { %1440 = vst [vmem:[#allocation5 + $0x1a0] sm:$0xff] %v1376_v45  ;;  %v1378_v44 = vadd.f32 %v2883_v27, %v1307_v38  ;;  %v1032_v21 = vsel %vm1030_vm9, %v1031_v31, %v1029_v11  ;;  %v1710_v13 = vpop.eup %1709  ;;  %v1036_v14 = vsel %vm1035_vm10, %v3110_v59, %v1034_v32  ;;  %v3337_v11 = vld [vmem:[#allocation19_spill] sm:$0xff] }
 0x1f9   :  { %1441 = vst [vmem:[#allocation5 + $0x1a8] sm:$0xff] %v1377_v10  ;;  %v1114_v7 = vadd.f32 1e-06, %v1032_v21  ;;  %v1712_v3 = vpop.eup %1711  ;;  %v1238_v41 = vmul.f32 %v1710_v13, %v3329_v63  ;;  %v1039_v58 = vsel %vm1037_vm11, %v1038_v24, %v1036_v14 }
 0x1fa   :  { %1442 = vst [vmem:[#allocation5 + $0x1b0] sm:$0xff] %v1378_v44  ;;  %v1714_v37 = vpop.eup %1713  ;;  %v1041_v61 = vmul.f32 %v1712_v3, %v3126_v36  ;;  %v1115_v20 = vadd.f32 1e-06, %v1039_v58 }
 0x1fb   :  { %1723 = vrcp.f32 %v1114_v7  ;;  %v1308_v25 = vmul.f32 %v2870_v54, %v1238_v41  ;;  %v1239_v52 = vmul.f32 %v1714_v37, %v3330_v47 }
 0x1fc   :  { %v1043_v33 = vsel %vm1042_vm12, %v3126_v36, %v1041_v61  ;;  %1725 = vrcp.f32 %v1115_v20 }
 0x1fd   :  { %v1716_v55 = vpop.eup %1715  ;;  %v1379_v59 = vadd.f32 %v2883_v27, %v1308_v25  ;;  %v1309_v16 = vmul.f32 %v2870_v54, %v1239_v52  ;;  %v1046_v60 = vsel %vm1044_vm13, %v1045_v23, %v1043_v33 }
 0x1fe   :  { %v1718_v46 = vpop.eup %1717  ;;  %v1240_v53 = vmul.f32 %v1716_v55, %v3331_v35  ;;  %v1116_v34 = vadd.f32 1e-06, %v1046_v60 }
 0x1ff   :  { %v1720_v18 = vpop.eup %1719  ;;  %1443 = vst [vmem:[#allocation5 + $0x1b8] sm:$0xff] %v1379_v59  ;;  %v1380_v9 = vadd.f32 %v2883_v27, %v1309_v16  ;;  %v1048_v49 = vmul.f32 %v1718_v46, %v3151_v19 }
 0x200   :  { %v1310_v36 = vmul.f32 %v2870_v54, %v1240_v53  ;;  %v1241_v42 = vmul.f32 %v1720_v18, %v3332_v1  ;;  %1727 = vrcp.f32 %v1116_v34 }
 0x201   :  { %1444 = vst [vmem:[#allocation5 + $0x1c0] sm:$0xff] %v1380_v9  ;;  %v1050_v8 = vsel %vm1049_vm14, %v3151_v19, %v1048_v49  ;;  %v1722_v4 = vpop.eup %1721  ;;  %v3334_v19 = vld [vmem:[#allocation17_spill] sm:$0xff] }
 0x202   :  { %v1381_v56 = vadd.f32 %v2883_v27, %v1310_v36  ;;  %v1311_v50 = vmul.f32 %v2870_v54, %v1241_v42  ;;  %v1053_v6 = vsel %vm1051_vm15, %v1052_v30, %v1050_v8  ;;  %v1242_v2 = vmul.f32 %v1722_v4, %v3333_v62 }
 0x203   :  { %v1117_v29 = vadd.f32 1e-06, %v1053_v6 }
 0x204   :  { %1445 = vst [vmem:[#allocation5 + $0x1c8] sm:$0xff] %v1381_v56  ;;  %v1382_v40 = vadd.f32 %v2883_v27, %v1311_v50  ;;  %v1312_v48 = vmul.f32 %v2870_v54, %v1242_v2 }
 0x205   :  { %1729 = vrcp.f32 %v1117_v29 }
 0x206   :  { %1446 = vst [vmem:[#allocation5 + $0x1d0] sm:$0xff] %v1382_v40  ;;  %v1383_v0 = vadd.f32 %v2883_v27, %v1312_v48 }
 0x208   :  { %v1724_v39 = vpop.eup %1723  ;;  %1447 = vst [vmem:[#allocation5 + $0x1d8] sm:$0xff] %v1383_v0 }
 0x209   :  { %v1243_v22 = vmul.f32 %v1724_v39, %v3334_v19  ;;  %v1726_v26 = vpop.eup %1725 }
 0x20a   :  { %v1244_v28 = vmul.f32 %v1726_v26, %v3335_v12 }
 0x20b   :  { %v1313_v17 = vmul.f32 %v2870_v54, %v1243_v22 }
 0x20c   :  { %v1314_v57 = vmul.f32 %v2870_v54, %v1244_v28 }
 0x20d   :  { %v1384_v15 = vadd.f32 %v2883_v27, %v1313_v17  ;;  %v1728_v5 = vpop.eup %1727 }
 0x20e   :  { %v1245_v45 = vmul.f32 %v1728_v5, %v3336_v43  ;;  %v1385_v38 = vadd.f32 %v2883_v27, %v1314_v57 }
 0x20f   :  { %1448 = vst [vmem:[#allocation5 + $0x1e0] sm:$0xff] %v1384_v15 }
 0x210   :  { %v1315_v31 = vmul.f32 %v2870_v54, %v1245_v45  ;;  %1449 = vst [vmem:[#allocation5 + $0x1e8] sm:$0xff] %v1385_v38 }
 0x212   :  { %v1730_v51 = vpop.eup %1729  ;;  %v1386_v10 = vadd.f32 %v2883_v27, %v1315_v31 }
 0x213   :  { %v1246_v44 = vmul.f32 %v1730_v51, %v3337_v11 }
 0x214   :  { %1450 = vst [vmem:[#allocation5 + $0x1f0] sm:$0xff] %v1386_v10 }
 0x215   :  { %v1316_v21 = vmul.f32 %v2870_v54, %v1246_v44 }
 0x217   :  { %v1387_v32 = vadd.f32 %v2883_v27, %v1316_v21 }
 0x219   :  { %1451 = vst [vmem:[#allocation5 + $0x1f8] sm:$0xff] %v1387_v32 }
 0x21a   :  { %1764 = shalt.err (!%p1761_p9)
}
 0x21b   :  { %1463 = dma.vmem_to_hbm [thread:$0]  %s1458_s25, 8192, %s3223_s3, [#allocation4], %s1778_s15, %s1778_s15, %s1779_s16  }
 0x21c   :  { %1775 = dma.done.wait [#allocation4], 8192  }
 0x21d   :  { %1776 = vsyncadd [#allocation4], 4294959104 }
 0x21e   :  { %1467 = vsyncpa [#allocation3], 1 }
 0x21f   :  { %1468 = vsyncpa [#allocation4], 1 }

</bundles_post_ra>
